<compile_context>
chip_gen: v5e
topology: v5e:2x2
jax: 0.10.0
libtpu: 0.0.40
codegen_flags: <defaults>
</compile_context>

<pallas_src>
import jax
import jax.numpy as jnp
from jax.experimental import pallas as pl
from jax.experimental.pallas import tpu as pltpu

GATE_BLOCK = 128   # each gate (r|z|n) gets its own 128-lane column block
SUBLANE = 8        # f32 sublane group


def _round_up(n, m):
    return ((n + m - 1) // m) * m


# --------------------------- fused RegGRU kernel -----------------------------

def make_reg_gru_kernel(num_layers, S, Bp, H, O):
    """Kernel ref layout (all whole-array VMEM blocks, no grid):
      inputs : x2d (S*Bp, D_pad), then per layer
               (wi (D,3*128), wh (H,3*128), bi (1,3*128), bhn (1,H)),
               then reg_wT (H,O), reg_b (1,O)
      outputs: y2d (S*Bp, O)
    """
    GW = GATE_BLOCK

    def kernel(*refs):
        it = iter(refs)
        x_ref = next(it)                                    # (S*Bp, D_pad)
        layer_refs = [tuple(next(it) for _ in range(4))     # (wi, wh, bi, bhn)
                      for _ in range(num_layers)]
        regw_ref = next(it)                                 # (H, O)
        regb_ref = next(it)                                 # (1, O)
        o_ref = next(it)                                    # (S*Bp, O)

        def gru_layer(x2d, wi_ref, wh_ref, bi_ref, bhn_ref):
            # Input projection for ALL timesteps in one batched matmul
            # (off the serial chain). b_ih and b_hr/b_hz are folded into bi.
            gi_all = (jnp.dot(x2d, wi_ref[...],
                              preferred_element_type=jnp.float32)
                      + bi_ref[...])                        # (S*Bp, 3*GW)
            wh = wh_ref[...]                                # (H, 3*GW)
            bhn_b = jnp.broadcast_to(bhn_ref[...], (Bp, H))  # hoisted broadcast
            h = jnp.zeros((Bp, H), jnp.float32)
            hs = []
            for t in range(S):                              # static unroll
                gi = gi_all[t * Bp:(t + 1) * Bp, :]         # sublane-aligned slab
                gh = jnp.dot(h, wh, preferred_element_type=jnp.float32)
                # per-gate slices start at lane 0 of their own 128-lane block
                r = jax.nn.sigmoid(gi[:, 0:H] + gh[:, 0:H])
                z = jax.nn.sigmoid(gi[:, GW:GW + H] + gh[:, GW:GW + H])
                n = jnp.tanh(gi[:, 2 * GW:2 * GW + H]
                             + r * (gh[:, 2 * GW:2 * GW + H] + bhn_b))
                h = (1.0 - z) * n + z * h
                hs.append(h)
            return jnp.concatenate(hs, axis=0)              # (S*Bp, H)

        cur = x_ref[...]
        for l in range(num_layers):
            cur = gru_layer(cur, *layer_refs[l])

        # Fused Linear head: one dot + one store of the whole slab.
        y = (jnp.dot(cur, regw_ref[...], preferred_element_type=jnp.float32)
             + regb_ref[...])
        o_ref[...] = y.astype(o_ref.dtype)

    return kernel


# --------------------------- parameter packing --------------------------------

def pack_params(gru_params, reg_w, reg_b):
    """One-time packing (outside the forward path).

    For each layer:
      wi : (D_pad, 3*128)  gate g's columns live in [g*128, g*128+H), rest zero
      wh : (H,     3*128)  same gate-block layout
      bi : (1,     3*128)  b_ih with b_hr / b_hz folded in (b_hn NOT folded)
      bhn: (1, H)          the n-gate hidden bias (stays inside r*(...))
    Layer-0 input dim is zero-padded 30 -> 32 (multiple of 8).
    """
    GW = GATE_BLOCK
    packed = []
    for layer_idx, (w_ih, w_hh, b_ih, b_hh) in enumerate(gru_params):
        three_h, d_in = w_ih.shape
        H = three_h // 3
        d_pad = _round_up(d_in, SUBLANE) if layer_idx == 0 else d_in

        wi = jnp.zeros((d_pad, 3 * GW), jnp.float32)
        wh = jnp.zeros((H, 3 * GW), jnp.float32)
        bi = jnp.zeros((1, 3 * GW), jnp.float32)
        for g in range(3):
            wi = wi.at[:d_in, g * GW:g * GW + H].set(
                jnp.asarray(w_ih[g * H:(g + 1) * H, :]).T)
            wh = wh.at[:, g * GW:g * GW + H].set(
                jnp.asarray(w_hh[g * H:(g + 1) * H, :]).T)
        # fold b_hr, b_hz into the precomputed input-side bias
        bi = bi.at[0, 0:H].set(b_ih[0:H] + b_hh[0:H])
        bi = bi.at[0, GW:GW + H].set(b_ih[H:2 * H] + b_hh[H:2 * H])
        bi = bi.at[0, 2 * GW:2 * GW + H].set(b_ih[2 * H:3 * H])
        bhn = jnp.asarray(b_hh[2 * H:3 * H]).reshape(1, H)

        packed.append((wi, wh, bi, bhn))

    return packed, jnp.asarray(reg_w).T, jnp.asarray(reg_b).reshape(1, -1)


# --------------------------- forward wrapper -----------------------------------

def reg_gru_forward(x, packed_layers, reg_wT, reg_b_row):
    """x: (S, B, inp_dim).  Returns (S, B, out_dim)."""
    S, B, D_in = x.shape
    H = packed_layers[0][1].shape[0]
    O = reg_wT.shape[1]
    D_pad = packed_layers[0][0].shape[0]
    num_layers = len(packed_layers)

    # Pad batch to a full sublane group (zero rows; GRU is row-independent
    # over batch, padded rows are sliced off afterwards).
    Bp = _round_up(max(B, SUBLANE), SUBLANE)
    xp = jnp.zeros((S, Bp, D_pad), jnp.float32)
    xp = xp.at[:, :B, :D_in].set(x.astype(jnp.float32))
    x2d = xp.reshape(S * Bp, D_pad)

    flat = []
    for p in packed_layers:
        flat.extend(p)

    kernel = make_reg_gru_kernel(num_layers, S, Bp, H, O)
    n_in = 1 + 4 * num_layers + 2
    vmem = pl.BlockSpec(memory_space=pltpu.MemorySpace.VMEM)

    y2d = pl.pallas_call(
        kernel,
        out_shape=jax.ShapeDtypeStruct((S * Bp, O), jnp.float32),
        in_specs=[vmem] * n_in,
        out_specs=vmem,
    )(x2d, *flat, reg_wT, reg_b_row)

    # Lane/layout plumbing outside the kernel: unpad batch, restore (S, B, O).
    return y2d.reshape(S, Bp, O)[:, :B, :]


# --------------------------- pure-JAX reference --------------------------------

def reg_gru_reference(x, gru_params, reg_w, reg_b):
    S, B, _ = x.shape
    out = x
    for (w_ih, w_hh, b_ih, b_hh) in gru_params:
        H = w_hh.shape[1]

        def step(h, xt):
            gi = xt @ w_ih.T + b_ih
            gh = h @ w_hh.T + b_hh
            i_r, i_z, i_n = jnp.split(gi, 3, axis=-1)
            h_r, h_z, h_n = jnp.split(gh, 3, axis=-1)
            r = jax.nn.sigmoid(i_r + h_r)
            z = jax.nn.sigmoid(i_z + h_z)
            n = jnp.tanh(i_n + r * h_n)
            h_new = (1.0 - z) * n + z * h
            return h_new, h_new

        h0 = jnp.zeros((B, H), jnp.float32)
        _, out = jax.lax.scan(step, h0, out)
    H = out.shape[-1]
    y = out.reshape(-1, H) @ reg_w.T + reg_b
    return y.reshape(S, B, -1)


# ----------------------------------- Main ---------------------------------------

if __name__ == "__main__":
    # RegGRU(inp_dim=30, out_dim=1, mod_dim=32, mid_layers=2)
    inp_dim, out_dim, mod_dim, mid_layers = 30, 1, 32, 2
    seq_len, batch = 8, 2

    key = jax.random.PRNGKey(0)
    k_in, key = jax.random.split(key)
    x = jax.random.normal(k_in, (seq_len, batch, inp_dim), dtype=jnp.float32)

    # Deterministic PyTorch-style init: U(-1/sqrt(H), 1/sqrt(H))
    bound = 1.0 / jnp.sqrt(jnp.float32(mod_dim))
    gru_params = []
    for layer in range(mid_layers):
        d_in = inp_dim if layer == 0 else mod_dim
        key, k1, k2, k3, k4 = jax.random.split(key, 5)
        w_ih = jax.random.uniform(k1, (3 * mod_dim, d_in), jnp.float32, -bound, bound)
        w_hh = jax.random.uniform(k2, (3 * mod_dim, mod_dim), jnp.float32, -bound, bound)
        b_ih = jax.random.uniform(k3, (3 * mod_dim,), jnp.float32, -bound, bound)
        b_hh = jax.random.uniform(k4, (3 * mod_dim,), jnp.float32, -bound, bound)
        gru_params.append((w_ih, w_hh, b_ih, b_hh))

    key, k5, k6 = jax.random.split(key, 3)
    reg_w = jax.random.uniform(k5, (out_dim, mod_dim), jnp.float32, -bound, bound)
    reg_b = jax.random.uniform(k6, (out_dim,), jnp.float32, -bound, bound)

    # Pack parameters once (outside the forward path).
    packed_layers, reg_wT, reg_b_row = pack_params(gru_params, reg_w, reg_b)

    y = reg_gru_forward(x, packed_layers, reg_wT, reg_b_row)
    y = jax.block_until_ready(y)

    y_ref = reg_gru_reference(x, gru_params, reg_w, reg_b)
    assert y.shape == (seq_len, batch, out_dim)
    assert jnp.allclose(y, y_ref, rtol=1e-5, atol=1e-5), \
        f"mismatch: max abs diff {jnp.max(jnp.abs(y - y_ref))}"

    print("KERNEL_OK")
</pallas_src>

<mosaic_0001>
module attributes {stable_mosaic.version = 11 : i64} {
  func.func @kernel(%arg0: memref<64x32xf32, #tpu.memory_space<vmem>>, %arg1: memref<32x384xf32, #tpu.memory_space<vmem>>, %arg2: memref<32x384xf32, #tpu.memory_space<vmem>>, %arg3: memref<1x384xf32, #tpu.memory_space<vmem>>, %arg4: memref<1x32xf32, #tpu.memory_space<vmem>>, %arg5: memref<32x384xf32, #tpu.memory_space<vmem>>, %arg6: memref<32x384xf32, #tpu.memory_space<vmem>>, %arg7: memref<1x384xf32, #tpu.memory_space<vmem>>, %arg8: memref<1x32xf32, #tpu.memory_space<vmem>>, %arg9: memref<32x1xf32, #tpu.memory_space<vmem>>, %arg10: memref<1x1xf32, #tpu.memory_space<vmem>>, %arg11: memref<64x1xf32, #tpu.memory_space<vmem>>) attributes {dimension_semantics = [], scalar_prefetch = 0 : i64, scratch_operands = 0 : i64, tpu.core_type = #tpu.core_type<tc>} {
    %c0 = arith.constant 0 : index
    %c0_0 = arith.constant 0 : index
    %0 = vector.load %arg0[%c0, %c0_0] : memref<64x32xf32, #tpu.memory_space<vmem>>, vector<64x32xf32>
    %c0_1 = arith.constant 0 : index
    %c0_2 = arith.constant 0 : index
    %1 = vector.load %arg1[%c0_1, %c0_2] : memref<32x384xf32, #tpu.memory_space<vmem>>, vector<32x384xf32>
    %cst = arith.constant dense<0.000000e+00> : vector<64x384xf32>
    %2 = tpu.matmul %0, %1, %cst {dimension_numbers = #tpu.dot_dimension_numbers<[1], [0], [0], [1], [0, 0, 1, 1], [], []>} : vector<64x32xf32>, vector<32x384xf32>, vector<64x384xf32> -> vector<64x384xf32>
    %c0_3 = arith.constant 0 : index
    %c0_4 = arith.constant 0 : index
    %3 = vector.load %arg3[%c0_3, %c0_4] : memref<1x384xf32, #tpu.memory_space<vmem>>, vector<1x384xf32>
    %4 = vector.broadcast %3 : vector<1x384xf32> to vector<64x384xf32>
    %5 = arith.addf %2, %4 : vector<64x384xf32>
    %c0_5 = arith.constant 0 : index
    %c0_6 = arith.constant 0 : index
    %6 = vector.load %arg2[%c0_5, %c0_6] : memref<32x384xf32, #tpu.memory_space<vmem>>, vector<32x384xf32>
    %c0_7 = arith.constant 0 : index
    %c0_8 = arith.constant 0 : index
    %7 = vector.load %arg4[%c0_7, %c0_8] : memref<1x32xf32, #tpu.memory_space<vmem>>, vector<1x32xf32>
    %8 = vector.shape_cast %7 : vector<1x32xf32> to vector<1x32xf32>
    %9 = vector.broadcast %8 : vector<1x32xf32> to vector<8x32xf32>
    %cst_9 = arith.constant 0.000000e+00 : f32
    %10 = vector.broadcast %cst_9 : f32 to vector<8x32xf32>
    %11 = vector.extract_strided_slice %5 {offsets = [0, 0], sizes = [8, 384], strides = [1, 1]} : vector<64x384xf32> to vector<8x384xf32>
    %cst_10 = arith.constant dense<0.000000e+00> : vector<8x384xf32>
    %12 = tpu.matmul %10, %6, %cst_10 {dimension_numbers = #tpu.dot_dimension_numbers<[1], [0], [0], [1], [0, 0, 1, 1], [], []>} : vector<8x32xf32>, vector<32x384xf32>, vector<8x384xf32> -> vector<8x384xf32>
    %13 = vector.extract_strided_slice %11 {offsets = [0, 0], sizes = [8, 32], strides = [1, 1]} : vector<8x384xf32> to vector<8x32xf32>
    %14 = vector.extract_strided_slice %12 {offsets = [0, 0], sizes = [8, 32], strides = [1, 1]} : vector<8x384xf32> to vector<8x32xf32>
    %15 = arith.addf %13, %14 : vector<8x32xf32>
    %16 = arith.negf %15 : vector<8x32xf32>
    %17 = math.exp %16 : vector<8x32xf32>
    %cst_11 = arith.constant 1.000000e+00 : f32
    %18 = vector.broadcast %cst_11 : f32 to vector<8x32xf32>
    %19 = arith.addf %18, %17 : vector<8x32xf32>
    %20 = arith.divf %18, %19 : vector<8x32xf32>
    %21 = vector.extract_strided_slice %11 {offsets = [0, 128], sizes = [8, 32], strides = [1, 1]} : vector<8x384xf32> to vector<8x32xf32>
    %22 = vector.extract_strided_slice %12 {offsets = [0, 128], sizes = [8, 32], strides = [1, 1]} : vector<8x384xf32> to vector<8x32xf32>
    %23 = arith.addf %21, %22 : vector<8x32xf32>
    %24 = arith.negf %23 : vector<8x32xf32>
    %25 = math.exp %24 : vector<8x32xf32>
    %cst_12 = arith.constant 1.000000e+00 : f32
    %26 = vector.broadcast %cst_12 : f32 to vector<8x32xf32>
    %27 = arith.addf %26, %25 : vector<8x32xf32>
    %28 = arith.divf %26, %27 : vector<8x32xf32>
    %29 = vector.extract_strided_slice %11 {offsets = [0, 256], sizes = [8, 32], strides = [1, 1]} : vector<8x384xf32> to vector<8x32xf32>
    %30 = vector.extract_strided_slice %12 {offsets = [0, 256], sizes = [8, 32], strides = [1, 1]} : vector<8x384xf32> to vector<8x32xf32>
    %31 = arith.addf %30, %9 : vector<8x32xf32>
    %32 = arith.mulf %20, %31 : vector<8x32xf32>
    %33 = arith.addf %29, %32 : vector<8x32xf32>
    %34 = math.tanh %33 : vector<8x32xf32>
    %cst_13 = arith.constant 1.000000e+00 : f32
    %35 = vector.broadcast %cst_13 : f32 to vector<8x32xf32>
    %36 = arith.subf %35, %28 : vector<8x32xf32>
    %37 = arith.mulf %36, %34 : vector<8x32xf32>
    %38 = arith.mulf %28, %10 : vector<8x32xf32>
    %39 = arith.addf %37, %38 : vector<8x32xf32>
    %40 = vector.extract_strided_slice %5 {offsets = [8, 0], sizes = [8, 384], strides = [1, 1]} : vector<64x384xf32> to vector<8x384xf32>
    %cst_14 = arith.constant dense<0.000000e+00> : vector<8x384xf32>
    %41 = tpu.matmul %39, %6, %cst_14 {dimension_numbers = #tpu.dot_dimension_numbers<[1], [0], [0], [1], [0, 0, 1, 1], [], []>} : vector<8x32xf32>, vector<32x384xf32>, vector<8x384xf32> -> vector<8x384xf32>
    %42 = vector.extract_strided_slice %40 {offsets = [0, 0], sizes = [8, 32], strides = [1, 1]} : vector<8x384xf32> to vector<8x32xf32>
    %43 = vector.extract_strided_slice %41 {offsets = [0, 0], sizes = [8, 32], strides = [1, 1]} : vector<8x384xf32> to vector<8x32xf32>
    %44 = arith.addf %42, %43 : vector<8x32xf32>
    %45 = arith.negf %44 : vector<8x32xf32>
    %46 = math.exp %45 : vector<8x32xf32>
    %cst_15 = arith.constant 1.000000e+00 : f32
    %47 = vector.broadcast %cst_15 : f32 to vector<8x32xf32>
    %48 = arith.addf %47, %46 : vector<8x32xf32>
    %49 = arith.divf %47, %48 : vector<8x32xf32>
    %50 = vector.extract_strided_slice %40 {offsets = [0, 128], sizes = [8, 32], strides = [1, 1]} : vector<8x384xf32> to vector<8x32xf32>
    %51 = vector.extract_strided_slice %41 {offsets = [0, 128], sizes = [8, 32], strides = [1, 1]} : vector<8x384xf32> to vector<8x32xf32>
    %52 = arith.addf %50, %51 : vector<8x32xf32>
    %53 = arith.negf %52 : vector<8x32xf32>
    %54 = math.exp %53 : vector<8x32xf32>
    %cst_16 = arith.constant 1.000000e+00 : f32
    %55 = vector.broadcast %cst_16 : f32 to vector<8x32xf32>
    %56 = arith.addf %55, %54 : vector<8x32xf32>
    %57 = arith.divf %55, %56 : vector<8x32xf32>
    %58 = vector.extract_strided_slice %40 {offsets = [0, 256], sizes = [8, 32], strides = [1, 1]} : vector<8x384xf32> to vector<8x32xf32>
    %59 = vector.extract_strided_slice %41 {offsets = [0, 256], sizes = [8, 32], strides = [1, 1]} : vector<8x384xf32> to vector<8x32xf32>
    %60 = arith.addf %59, %9 : vector<8x32xf32>
    %61 = arith.mulf %49, %60 : vector<8x32xf32>
    %62 = arith.addf %58, %61 : vector<8x32xf32>
    %63 = math.tanh %62 : vector<8x32xf32>
    %cst_17 = arith.constant 1.000000e+00 : f32
    %64 = vector.broadcast %cst_17 : f32 to vector<8x32xf32>
    %65 = arith.subf %64, %57 : vector<8x32xf32>
    %66 = arith.mulf %65, %63 : vector<8x32xf32>
    %67 = arith.mulf %57, %39 : vector<8x32xf32>
    %68 = arith.addf %66, %67 : vector<8x32xf32>
    %69 = vector.extract_strided_slice %5 {offsets = [16, 0], sizes = [8, 384], strides = [1, 1]} : vector<64x384xf32> to vector<8x384xf32>
    %cst_18 = arith.constant dense<0.000000e+00> : vector<8x384xf32>
    %70 = tpu.matmul %68, %6, %cst_18 {dimension_numbers = #tpu.dot_dimension_numbers<[1], [0], [0], [1], [0, 0, 1, 1], [], []>} : vector<8x32xf32>, vector<32x384xf32>, vector<8x384xf32> -> vector<8x384xf32>
    %71 = vector.extract_strided_slice %69 {offsets = [0, 0], sizes = [8, 32], strides = [1, 1]} : vector<8x384xf32> to vector<8x32xf32>
    %72 = vector.extract_strided_slice %70 {offsets = [0, 0], sizes = [8, 32], strides = [1, 1]} : vector<8x384xf32> to vector<8x32xf32>
    %73 = arith.addf %71, %72 : vector<8x32xf32>
    %74 = arith.negf %73 : vector<8x32xf32>
    %75 = math.exp %74 : vector<8x32xf32>
    %cst_19 = arith.constant 1.000000e+00 : f32
    %76 = vector.broadcast %cst_19 : f32 to vector<8x32xf32>
    %77 = arith.addf %76, %75 : vector<8x32xf32>
    %78 = arith.divf %76, %77 : vector<8x32xf32>
    %79 = vector.extract_strided_slice %69 {offsets = [0, 128], sizes = [8, 32], strides = [1, 1]} : vector<8x384xf32> to vector<8x32xf32>
    %80 = vector.extract_strided_slice %70 {offsets = [0, 128], sizes = [8, 32], strides = [1, 1]} : vector<8x384xf32> to vector<8x32xf32>
    %81 = arith.addf %79, %80 : vector<8x32xf32>
    %82 = arith.negf %81 : vector<8x32xf32>
    %83 = math.exp %82 : vector<8x32xf32>
    %cst_20 = arith.constant 1.000000e+00 : f32
    %84 = vector.broadcast %cst_20 : f32 to vector<8x32xf32>
    %85 = arith.addf %84, %83 : vector<8x32xf32>
    %86 = arith.divf %84, %85 : vector<8x32xf32>
    %87 = vector.extract_strided_slice %69 {offsets = [0, 256], sizes = [8, 32], strides = [1, 1]} : vector<8x384xf32> to vector<8x32xf32>
    %88 = vector.extract_strided_slice %70 {offsets = [0, 256], sizes = [8, 32], strides = [1, 1]} : vector<8x384xf32> to vector<8x32xf32>
    %89 = arith.addf %88, %9 : vector<8x32xf32>
    %90 = arith.mulf %78, %89 : vector<8x32xf32>
    %91 = arith.addf %87, %90 : vector<8x32xf32>
    %92 = math.tanh %91 : vector<8x32xf32>
    %cst_21 = arith.constant 1.000000e+00 : f32
    %93 = vector.broadcast %cst_21 : f32 to vector<8x32xf32>
    %94 = arith.subf %93, %86 : vector<8x32xf32>
    %95 = arith.mulf %94, %92 : vector<8x32xf32>
    %96 = arith.mulf %86, %68 : vector<8x32xf32>
    %97 = arith.addf %95, %96 : vector<8x32xf32>
    %98 = vector.extract_strided_slice %5 {offsets = [24, 0], sizes = [8, 384], strides = [1, 1]} : vector<64x384xf32> to vector<8x384xf32>
    %cst_22 = arith.constant dense<0.000000e+00> : vector<8x384xf32>
    %99 = tpu.matmul %97, %6, %cst_22 {dimension_numbers = #tpu.dot_dimension_numbers<[1], [0], [0], [1], [0, 0, 1, 1], [], []>} : vector<8x32xf32>, vector<32x384xf32>, vector<8x384xf32> -> vector<8x384xf32>
    %100 = vector.extract_strided_slice %98 {offsets = [0, 0], sizes = [8, 32], strides = [1, 1]} : vector<8x384xf32> to vector<8x32xf32>
    %101 = vector.extract_strided_slice %99 {offsets = [0, 0], sizes = [8, 32], strides = [1, 1]} : vector<8x384xf32> to vector<8x32xf32>
    %102 = arith.addf %100, %101 : vector<8x32xf32>
    %103 = arith.negf %102 : vector<8x32xf32>
    %104 = math.exp %103 : vector<8x32xf32>
    %cst_23 = arith.constant 1.000000e+00 : f32
    %105 = vector.broadcast %cst_23 : f32 to vector<8x32xf32>
    %106 = arith.addf %105, %104 : vector<8x32xf32>
    %107 = arith.divf %105, %106 : vector<8x32xf32>
    %108 = vector.extract_strided_slice %98 {offsets = [0, 128], sizes = [8, 32], strides = [1, 1]} : vector<8x384xf32> to vector<8x32xf32>
    %109 = vector.extract_strided_slice %99 {offsets = [0, 128], sizes = [8, 32], strides = [1, 1]} : vector<8x384xf32> to vector<8x32xf32>
    %110 = arith.addf %108, %109 : vector<8x32xf32>
    %111 = arith.negf %110 : vector<8x32xf32>
    %112 = math.exp %111 : vector<8x32xf32>
    %cst_24 = arith.constant 1.000000e+00 : f32
    %113 = vector.broadcast %cst_24 : f32 to vector<8x32xf32>
    %114 = arith.addf %113, %112 : vector<8x32xf32>
    %115 = arith.divf %113, %114 : vector<8x32xf32>
    %116 = vector.extract_strided_slice %98 {offsets = [0, 256], sizes = [8, 32], strides = [1, 1]} : vector<8x384xf32> to vector<8x32xf32>
    %117 = vector.extract_strided_slice %99 {offsets = [0, 256], sizes = [8, 32], strides = [1, 1]} : vector<8x384xf32> to vector<8x32xf32>
    %118 = arith.addf %117, %9 : vector<8x32xf32>
    %119 = arith.mulf %107, %118 : vector<8x32xf32>
    %120 = arith.addf %116, %119 : vector<8x32xf32>
    %121 = math.tanh %120 : vector<8x32xf32>
    %cst_25 = arith.constant 1.000000e+00 : f32
    %122 = vector.broadcast %cst_25 : f32 to vector<8x32xf32>
    %123 = arith.subf %122, %115 : vector<8x32xf32>
    %124 = arith.mulf %123, %121 : vector<8x32xf32>
    %125 = arith.mulf %115, %97 : vector<8x32xf32>
    %126 = arith.addf %124, %125 : vector<8x32xf32>
    %127 = vector.extract_strided_slice %5 {offsets = [32, 0], sizes = [8, 384], strides = [1, 1]} : vector<64x384xf32> to vector<8x384xf32>
    %cst_26 = arith.constant dense<0.000000e+00> : vector<8x384xf32>
    %128 = tpu.matmul %126, %6, %cst_26 {dimension_numbers = #tpu.dot_dimension_numbers<[1], [0], [0], [1], [0, 0, 1, 1], [], []>} : vector<8x32xf32>, vector<32x384xf32>, vector<8x384xf32> -> vector<8x384xf32>
    %129 = vector.extract_strided_slice %127 {offsets = [0, 0], sizes = [8, 32], strides = [1, 1]} : vector<8x384xf32> to vector<8x32xf32>
    %130 = vector.extract_strided_slice %128 {offsets = [0, 0], sizes = [8, 32], strides = [1, 1]} : vector<8x384xf32> to vector<8x32xf32>
    %131 = arith.addf %129, %130 : vector<8x32xf32>
    %132 = arith.negf %131 : vector<8x32xf32>
    %133 = math.exp %132 : vector<8x32xf32>
    %cst_27 = arith.constant 1.000000e+00 : f32
    %134 = vector.broadcast %cst_27 : f32 to vector<8x32xf32>
    %135 = arith.addf %134, %133 : vector<8x32xf32>
    %136 = arith.divf %134, %135 : vector<8x32xf32>
    %137 = vector.extract_strided_slice %127 {offsets = [0, 128], sizes = [8, 32], strides = [1, 1]} : vector<8x384xf32> to vector<8x32xf32>
    %138 = vector.extract_strided_slice %128 {offsets = [0, 128], sizes = [8, 32], strides = [1, 1]} : vector<8x384xf32> to vector<8x32xf32>
    %139 = arith.addf %137, %138 : vector<8x32xf32>
    %140 = arith.negf %139 : vector<8x32xf32>
    %141 = math.exp %140 : vector<8x32xf32>
    %cst_28 = arith.constant 1.000000e+00 : f32
    %142 = vector.broadcast %cst_28 : f32 to vector<8x32xf32>
    %143 = arith.addf %142, %141 : vector<8x32xf32>
    %144 = arith.divf %142, %143 : vector<8x32xf32>
    %145 = vector.extract_strided_slice %127 {offsets = [0, 256], sizes = [8, 32], strides = [1, 1]} : vector<8x384xf32> to vector<8x32xf32>
    %146 = vector.extract_strided_slice %128 {offsets = [0, 256], sizes = [8, 32], strides = [1, 1]} : vector<8x384xf32> to vector<8x32xf32>
    %147 = arith.addf %146, %9 : vector<8x32xf32>
    %148 = arith.mulf %136, %147 : vector<8x32xf32>
    %149 = arith.addf %145, %148 : vector<8x32xf32>
    %150 = math.tanh %149 : vector<8x32xf32>
    %cst_29 = arith.constant 1.000000e+00 : f32
    %151 = vector.broadcast %cst_29 : f32 to vector<8x32xf32>
    %152 = arith.subf %151, %144 : vector<8x32xf32>
    %153 = arith.mulf %152, %150 : vector<8x32xf32>
    %154 = arith.mulf %144, %126 : vector<8x32xf32>
    %155 = arith.addf %153, %154 : vector<8x32xf32>
    %156 = vector.extract_strided_slice %5 {offsets = [40, 0], sizes = [8, 384], strides = [1, 1]} : vector<64x384xf32> to vector<8x384xf32>
    %cst_30 = arith.constant dense<0.000000e+00> : vector<8x384xf32>
    %157 = tpu.matmul %155, %6, %cst_30 {dimension_numbers = #tpu.dot_dimension_numbers<[1], [0], [0], [1], [0, 0, 1, 1], [], []>} : vector<8x32xf32>, vector<32x384xf32>, vector<8x384xf32> -> vector<8x384xf32>
    %158 = vector.extract_strided_slice %156 {offsets = [0, 0], sizes = [8, 32], strides = [1, 1]} : vector<8x384xf32> to vector<8x32xf32>
    %159 = vector.extract_strided_slice %157 {offsets = [0, 0], sizes = [8, 32], strides = [1, 1]} : vector<8x384xf32> to vector<8x32xf32>
    %160 = arith.addf %158, %159 : vector<8x32xf32>
    %161 = arith.negf %160 : vector<8x32xf32>
    %162 = math.exp %161 : vector<8x32xf32>
    %cst_31 = arith.constant 1.000000e+00 : f32
    %163 = vector.broadcast %cst_31 : f32 to vector<8x32xf32>
    %164 = arith.addf %163, %162 : vector<8x32xf32>
    %165 = arith.divf %163, %164 : vector<8x32xf32>
    %166 = vector.extract_strided_slice %156 {offsets = [0, 128], sizes = [8, 32], strides = [1, 1]} : vector<8x384xf32> to vector<8x32xf32>
    %167 = vector.extract_strided_slice %157 {offsets = [0, 128], sizes = [8, 32], strides = [1, 1]} : vector<8x384xf32> to vector<8x32xf32>
    %168 = arith.addf %166, %167 : vector<8x32xf32>
    %169 = arith.negf %168 : vector<8x32xf32>
    %170 = math.exp %169 : vector<8x32xf32>
    %cst_32 = arith.constant 1.000000e+00 : f32
    %171 = vector.broadcast %cst_32 : f32 to vector<8x32xf32>
    %172 = arith.addf %171, %170 : vector<8x32xf32>
    %173 = arith.divf %171, %172 : vector<8x32xf32>
    %174 = vector.extract_strided_slice %156 {offsets = [0, 256], sizes = [8, 32], strides = [1, 1]} : vector<8x384xf32> to vector<8x32xf32>
    %175 = vector.extract_strided_slice %157 {offsets = [0, 256], sizes = [8, 32], strides = [1, 1]} : vector<8x384xf32> to vector<8x32xf32>
    %176 = arith.addf %175, %9 : vector<8x32xf32>
    %177 = arith.mulf %165, %176 : vector<8x32xf32>
    %178 = arith.addf %174, %177 : vector<8x32xf32>
    %179 = math.tanh %178 : vector<8x32xf32>
    %cst_33 = arith.constant 1.000000e+00 : f32
    %180 = vector.broadcast %cst_33 : f32 to vector<8x32xf32>
    %181 = arith.subf %180, %173 : vector<8x32xf32>
    %182 = arith.mulf %181, %179 : vector<8x32xf32>
    %183 = arith.mulf %173, %155 : vector<8x32xf32>
    %184 = arith.addf %182, %183 : vector<8x32xf32>
    %185 = vector.extract_strided_slice %5 {offsets = [48, 0], sizes = [8, 384], strides = [1, 1]} : vector<64x384xf32> to vector<8x384xf32>
    %cst_34 = arith.constant dense<0.000000e+00> : vector<8x384xf32>
    %186 = tpu.matmul %184, %6, %cst_34 {dimension_numbers = #tpu.dot_dimension_numbers<[1], [0], [0], [1], [0, 0, 1, 1], [], []>} : vector<8x32xf32>, vector<32x384xf32>, vector<8x384xf32> -> vector<8x384xf32>
    %187 = vector.extract_strided_slice %185 {offsets = [0, 0], sizes = [8, 32], strides = [1, 1]} : vector<8x384xf32> to vector<8x32xf32>
    %188 = vector.extract_strided_slice %186 {offsets = [0, 0], sizes = [8, 32], strides = [1, 1]} : vector<8x384xf32> to vector<8x32xf32>
    %189 = arith.addf %187, %188 : vector<8x32xf32>
    %190 = arith.negf %189 : vector<8x32xf32>
    %191 = math.exp %190 : vector<8x32xf32>
    %cst_35 = arith.constant 1.000000e+00 : f32
    %192 = vector.broadcast %cst_35 : f32 to vector<8x32xf32>
    %193 = arith.addf %192, %191 : vector<8x32xf32>
    %194 = arith.divf %192, %193 : vector<8x32xf32>
    %195 = vector.extract_strided_slice %185 {offsets = [0, 128], sizes = [8, 32], strides = [1, 1]} : vector<8x384xf32> to vector<8x32xf32>
    %196 = vector.extract_strided_slice %186 {offsets = [0, 128], sizes = [8, 32], strides = [1, 1]} : vector<8x384xf32> to vector<8x32xf32>
    %197 = arith.addf %195, %196 : vector<8x32xf32>
    %198 = arith.negf %197 : vector<8x32xf32>
    %199 = math.exp %198 : vector<8x32xf32>
    %cst_36 = arith.constant 1.000000e+00 : f32
    %200 = vector.broadcast %cst_36 : f32 to vector<8x32xf32>
    %201 = arith.addf %200, %199 : vector<8x32xf32>
    %202 = arith.divf %200, %201 : vector<8x32xf32>
    %203 = vector.extract_strided_slice %185 {offsets = [0, 256], sizes = [8, 32], strides = [1, 1]} : vector<8x384xf32> to vector<8x32xf32>
    %204 = vector.extract_strided_slice %186 {offsets = [0, 256], sizes = [8, 32], strides = [1, 1]} : vector<8x384xf32> to vector<8x32xf32>
    %205 = arith.addf %204, %9 : vector<8x32xf32>
    %206 = arith.mulf %194, %205 : vector<8x32xf32>
    %207 = arith.addf %203, %206 : vector<8x32xf32>
    %208 = math.tanh %207 : vector<8x32xf32>
    %cst_37 = arith.constant 1.000000e+00 : f32
    %209 = vector.broadcast %cst_37 : f32 to vector<8x32xf32>
    %210 = arith.subf %209, %202 : vector<8x32xf32>
    %211 = arith.mulf %210, %208 : vector<8x32xf32>
    %212 = arith.mulf %202, %184 : vector<8x32xf32>
    %213 = arith.addf %211, %212 : vector<8x32xf32>
    %214 = vector.extract_strided_slice %5 {offsets = [56, 0], sizes = [8, 384], strides = [1, 1]} : vector<64x384xf32> to vector<8x384xf32>
    %cst_38 = arith.constant dense<0.000000e+00> : vector<8x384xf32>
    %215 = tpu.matmul %213, %6, %cst_38 {dimension_numbers = #tpu.dot_dimension_numbers<[1], [0], [0], [1], [0, 0, 1, 1], [], []>} : vector<8x32xf32>, vector<32x384xf32>, vector<8x384xf32> -> vector<8x384xf32>
    %216 = vector.extract_strided_slice %214 {offsets = [0, 0], sizes = [8, 32], strides = [1, 1]} : vector<8x384xf32> to vector<8x32xf32>
    %217 = vector.extract_strided_slice %215 {offsets = [0, 0], sizes = [8, 32], strides = [1, 1]} : vector<8x384xf32> to vector<8x32xf32>
    %218 = arith.addf %216, %217 : vector<8x32xf32>
    %219 = arith.negf %218 : vector<8x32xf32>
    %220 = math.exp %219 : vector<8x32xf32>
    %cst_39 = arith.constant 1.000000e+00 : f32
    %221 = vector.broadcast %cst_39 : f32 to vector<8x32xf32>
    %222 = arith.addf %221, %220 : vector<8x32xf32>
    %223 = arith.divf %221, %222 : vector<8x32xf32>
    %224 = vector.extract_strided_slice %214 {offsets = [0, 128], sizes = [8, 32], strides = [1, 1]} : vector<8x384xf32> to vector<8x32xf32>
    %225 = vector.extract_strided_slice %215 {offsets = [0, 128], sizes = [8, 32], strides = [1, 1]} : vector<8x384xf32> to vector<8x32xf32>
    %226 = arith.addf %224, %225 : vector<8x32xf32>
    %227 = arith.negf %226 : vector<8x32xf32>
    %228 = math.exp %227 : vector<8x32xf32>
    %cst_40 = arith.constant 1.000000e+00 : f32
    %229 = vector.broadcast %cst_40 : f32 to vector<8x32xf32>
    %230 = arith.addf %229, %228 : vector<8x32xf32>
    %231 = arith.divf %229, %230 : vector<8x32xf32>
    %232 = vector.extract_strided_slice %214 {offsets = [0, 256], sizes = [8, 32], strides = [1, 1]} : vector<8x384xf32> to vector<8x32xf32>
    %233 = vector.extract_strided_slice %215 {offsets = [0, 256], sizes = [8, 32], strides = [1, 1]} : vector<8x384xf32> to vector<8x32xf32>
    %234 = arith.addf %233, %9 : vector<8x32xf32>
    %235 = arith.mulf %223, %234 : vector<8x32xf32>
    %236 = arith.addf %232, %235 : vector<8x32xf32>
    %237 = math.tanh %236 : vector<8x32xf32>
    %cst_41 = arith.constant 1.000000e+00 : f32
    %238 = vector.broadcast %cst_41 : f32 to vector<8x32xf32>
    %239 = arith.subf %238, %231 : vector<8x32xf32>
    %240 = arith.mulf %239, %237 : vector<8x32xf32>
    %241 = arith.mulf %231, %213 : vector<8x32xf32>
    %242 = arith.addf %240, %241 : vector<8x32xf32>
    %243 = tpu.concatenate %39, %68, %97, %126, %155, %184, %213, %242 in 0 : vector<8x32xf32>, vector<8x32xf32>, vector<8x32xf32>, vector<8x32xf32>, vector<8x32xf32>, vector<8x32xf32>, vector<8x32xf32>, vector<8x32xf32> -> vector<64x32xf32>
    %c0_42 = arith.constant 0 : index
    %c0_43 = arith.constant 0 : index
    %244 = vector.load %arg5[%c0_42, %c0_43] : memref<32x384xf32, #tpu.memory_space<vmem>>, vector<32x384xf32>
    %cst_44 = arith.constant dense<0.000000e+00> : vector<64x384xf32>
    %245 = tpu.matmul %243, %244, %cst_44 {dimension_numbers = #tpu.dot_dimension_numbers<[1], [0], [0], [1], [0, 0, 1, 1], [], []>} : vector<64x32xf32>, vector<32x384xf32>, vector<64x384xf32> -> vector<64x384xf32>
    %c0_45 = arith.constant 0 : index
    %c0_46 = arith.constant 0 : index
    %246 = vector.load %arg7[%c0_45, %c0_46] : memref<1x384xf32, #tpu.memory_space<vmem>>, vector<1x384xf32>
    %247 = vector.broadcast %246 : vector<1x384xf32> to vector<64x384xf32>
    %248 = arith.addf %245, %247 : vector<64x384xf32>
    %c0_47 = arith.constant 0 : index
    %c0_48 = arith.constant 0 : index
    %249 = vector.load %arg6[%c0_47, %c0_48] : memref<32x384xf32, #tpu.memory_space<vmem>>, vector<32x384xf32>
    %c0_49 = arith.constant 0 : index
    %c0_50 = arith.constant 0 : index
    %250 = vector.load %arg8[%c0_49, %c0_50] : memref<1x32xf32, #tpu.memory_space<vmem>>, vector<1x32xf32>
    %251 = vector.shape_cast %250 : vector<1x32xf32> to vector<1x32xf32>
    %252 = vector.broadcast %251 : vector<1x32xf32> to vector<8x32xf32>
    %cst_51 = arith.constant 0.000000e+00 : f32
    %253 = vector.broadcast %cst_51 : f32 to vector<8x32xf32>
    %254 = vector.extract_strided_slice %248 {offsets = [0, 0], sizes = [8, 384], strides = [1, 1]} : vector<64x384xf32> to vector<8x384xf32>
    %cst_52 = arith.constant dense<0.000000e+00> : vector<8x384xf32>
    %255 = tpu.matmul %253, %249, %cst_52 {dimension_numbers = #tpu.dot_dimension_numbers<[1], [0], [0], [1], [0, 0, 1, 1], [], []>} : vector<8x32xf32>, vector<32x384xf32>, vector<8x384xf32> -> vector<8x384xf32>
    %256 = vector.extract_strided_slice %254 {offsets = [0, 0], sizes = [8, 32], strides = [1, 1]} : vector<8x384xf32> to vector<8x32xf32>
    %257 = vector.extract_strided_slice %255 {offsets = [0, 0], sizes = [8, 32], strides = [1, 1]} : vector<8x384xf32> to vector<8x32xf32>
    %258 = arith.addf %256, %257 : vector<8x32xf32>
    %259 = arith.negf %258 : vector<8x32xf32>
    %260 = math.exp %259 : vector<8x32xf32>
    %cst_53 = arith.constant 1.000000e+00 : f32
    %261 = vector.broadcast %cst_53 : f32 to vector<8x32xf32>
    %262 = arith.addf %261, %260 : vector<8x32xf32>
    %263 = arith.divf %261, %262 : vector<8x32xf32>
    %264 = vector.extract_strided_slice %254 {offsets = [0, 128], sizes = [8, 32], strides = [1, 1]} : vector<8x384xf32> to vector<8x32xf32>
    %265 = vector.extract_strided_slice %255 {offsets = [0, 128], sizes = [8, 32], strides = [1, 1]} : vector<8x384xf32> to vector<8x32xf32>
    %266 = arith.addf %264, %265 : vector<8x32xf32>
    %267 = arith.negf %266 : vector<8x32xf32>
    %268 = math.exp %267 : vector<8x32xf32>
    %cst_54 = arith.constant 1.000000e+00 : f32
    %269 = vector.broadcast %cst_54 : f32 to vector<8x32xf32>
    %270 = arith.addf %269, %268 : vector<8x32xf32>
    %271 = arith.divf %269, %270 : vector<8x32xf32>
    %272 = vector.extract_strided_slice %254 {offsets = [0, 256], sizes = [8, 32], strides = [1, 1]} : vector<8x384xf32> to vector<8x32xf32>
    %273 = vector.extract_strided_slice %255 {offsets = [0, 256], sizes = [8, 32], strides = [1, 1]} : vector<8x384xf32> to vector<8x32xf32>
    %274 = arith.addf %273, %252 : vector<8x32xf32>
    %275 = arith.mulf %263, %274 : vector<8x32xf32>
    %276 = arith.addf %272, %275 : vector<8x32xf32>
    %277 = math.tanh %276 : vector<8x32xf32>
    %cst_55 = arith.constant 1.000000e+00 : f32
    %278 = vector.broadcast %cst_55 : f32 to vector<8x32xf32>
    %279 = arith.subf %278, %271 : vector<8x32xf32>
    %280 = arith.mulf %279, %277 : vector<8x32xf32>
    %281 = arith.mulf %271, %253 : vector<8x32xf32>
    %282 = arith.addf %280, %281 : vector<8x32xf32>
    %283 = vector.extract_strided_slice %248 {offsets = [8, 0], sizes = [8, 384], strides = [1, 1]} : vector<64x384xf32> to vector<8x384xf32>
    %cst_56 = arith.constant dense<0.000000e+00> : vector<8x384xf32>
    %284 = tpu.matmul %282, %249, %cst_56 {dimension_numbers = #tpu.dot_dimension_numbers<[1], [0], [0], [1], [0, 0, 1, 1], [], []>} : vector<8x32xf32>, vector<32x384xf32>, vector<8x384xf32> -> vector<8x384xf32>
    %285 = vector.extract_strided_slice %283 {offsets = [0, 0], sizes = [8, 32], strides = [1, 1]} : vector<8x384xf32> to vector<8x32xf32>
    %286 = vector.extract_strided_slice %284 {offsets = [0, 0], sizes = [8, 32], strides = [1, 1]} : vector<8x384xf32> to vector<8x32xf32>
    %287 = arith.addf %285, %286 : vector<8x32xf32>
    %288 = arith.negf %287 : vector<8x32xf32>
    %289 = math.exp %288 : vector<8x32xf32>
    %cst_57 = arith.constant 1.000000e+00 : f32
    %290 = vector.broadcast %cst_57 : f32 to vector<8x32xf32>
    %291 = arith.addf %290, %289 : vector<8x32xf32>
    %292 = arith.divf %290, %291 : vector<8x32xf32>
    %293 = vector.extract_strided_slice %283 {offsets = [0, 128], sizes = [8, 32], strides = [1, 1]} : vector<8x384xf32> to vector<8x32xf32>
    %294 = vector.extract_strided_slice %284 {offsets = [0, 128], sizes = [8, 32], strides = [1, 1]} : vector<8x384xf32> to vector<8x32xf32>
    %295 = arith.addf %293, %294 : vector<8x32xf32>
    %296 = arith.negf %295 : vector<8x32xf32>
    %297 = math.exp %296 : vector<8x32xf32>
    %cst_58 = arith.constant 1.000000e+00 : f32
    %298 = vector.broadcast %cst_58 : f32 to vector<8x32xf32>
    %299 = arith.addf %298, %297 : vector<8x32xf32>
    %300 = arith.divf %298, %299 : vector<8x32xf32>
    %301 = vector.extract_strided_slice %283 {offsets = [0, 256], sizes = [8, 32], strides = [1, 1]} : vector<8x384xf32> to vector<8x32xf32>
    %302 = vector.extract_strided_slice %284 {offsets = [0, 256], sizes = [8, 32], strides = [1, 1]} : vector<8x384xf32> to vector<8x32xf32>
    %303 = arith.addf %302, %252 : vector<8x32xf32>
    %304 = arith.mulf %292, %303 : vector<8x32xf32>
    %305 = arith.addf %301, %304 : vector<8x32xf32>
    %306 = math.tanh %305 : vector<8x32xf32>
    %cst_59 = arith.constant 1.000000e+00 : f32
    %307 = vector.broadcast %cst_59 : f32 to vector<8x32xf32>
    %308 = arith.subf %307, %300 : vector<8x32xf32>
    %309 = arith.mulf %308, %306 : vector<8x32xf32>
    %310 = arith.mulf %300, %282 : vector<8x32xf32>
    %311 = arith.addf %309, %310 : vector<8x32xf32>
    %312 = vector.extract_strided_slice %248 {offsets = [16, 0], sizes = [8, 384], strides = [1, 1]} : vector<64x384xf32> to vector<8x384xf32>
    %cst_60 = arith.constant dense<0.000000e+00> : vector<8x384xf32>
    %313 = tpu.matmul %311, %249, %cst_60 {dimension_numbers = #tpu.dot_dimension_numbers<[1], [0], [0], [1], [0, 0, 1, 1], [], []>} : vector<8x32xf32>, vector<32x384xf32>, vector<8x384xf32> -> vector<8x384xf32>
    %314 = vector.extract_strided_slice %312 {offsets = [0, 0], sizes = [8, 32], strides = [1, 1]} : vector<8x384xf32> to vector<8x32xf32>
    %315 = vector.extract_strided_slice %313 {offsets = [0, 0], sizes = [8, 32], strides = [1, 1]} : vector<8x384xf32> to vector<8x32xf32>
    %316 = arith.addf %314, %315 : vector<8x32xf32>
    %317 = arith.negf %316 : vector<8x32xf32>
    %318 = math.exp %317 : vector<8x32xf32>
    %cst_61 = arith.constant 1.000000e+00 : f32
    %319 = vector.broadcast %cst_61 : f32 to vector<8x32xf32>
    %320 = arith.addf %319, %318 : vector<8x32xf32>
    %321 = arith.divf %319, %320 : vector<8x32xf32>
    %322 = vector.extract_strided_slice %312 {offsets = [0, 128], sizes = [8, 32], strides = [1, 1]} : vector<8x384xf32> to vector<8x32xf32>
    %323 = vector.extract_strided_slice %313 {offsets = [0, 128], sizes = [8, 32], strides = [1, 1]} : vector<8x384xf32> to vector<8x32xf32>
    %324 = arith.addf %322, %323 : vector<8x32xf32>
    %325 = arith.negf %324 : vector<8x32xf32>
    %326 = math.exp %325 : vector<8x32xf32>
    %cst_62 = arith.constant 1.000000e+00 : f32
    %327 = vector.broadcast %cst_62 : f32 to vector<8x32xf32>
    %328 = arith.addf %327, %326 : vector<8x32xf32>
    %329 = arith.divf %327, %328 : vector<8x32xf32>
    %330 = vector.extract_strided_slice %312 {offsets = [0, 256], sizes = [8, 32], strides = [1, 1]} : vector<8x384xf32> to vector<8x32xf32>
    %331 = vector.extract_strided_slice %313 {offsets = [0, 256], sizes = [8, 32], strides = [1, 1]} : vector<8x384xf32> to vector<8x32xf32>
    %332 = arith.addf %331, %252 : vector<8x32xf32>
    %333 = arith.mulf %321, %332 : vector<8x32xf32>
    %334 = arith.addf %330, %333 : vector<8x32xf32>
    %335 = math.tanh %334 : vector<8x32xf32>
    %cst_63 = arith.constant 1.000000e+00 : f32
    %336 = vector.broadcast %cst_63 : f32 to vector<8x32xf32>
    %337 = arith.subf %336, %329 : vector<8x32xf32>
    %338 = arith.mulf %337, %335 : vector<8x32xf32>
    %339 = arith.mulf %329, %311 : vector<8x32xf32>
    %340 = arith.addf %338, %339 : vector<8x32xf32>
    %341 = vector.extract_strided_slice %248 {offsets = [24, 0], sizes = [8, 384], strides = [1, 1]} : vector<64x384xf32> to vector<8x384xf32>
    %cst_64 = arith.constant dense<0.000000e+00> : vector<8x384xf32>
    %342 = tpu.matmul %340, %249, %cst_64 {dimension_numbers = #tpu.dot_dimension_numbers<[1], [0], [0], [1], [0, 0, 1, 1], [], []>} : vector<8x32xf32>, vector<32x384xf32>, vector<8x384xf32> -> vector<8x384xf32>
    %343 = vector.extract_strided_slice %341 {offsets = [0, 0], sizes = [8, 32], strides = [1, 1]} : vector<8x384xf32> to vector<8x32xf32>
    %344 = vector.extract_strided_slice %342 {offsets = [0, 0], sizes = [8, 32], strides = [1, 1]} : vector<8x384xf32> to vector<8x32xf32>
    %345 = arith.addf %343, %344 : vector<8x32xf32>
    %346 = arith.negf %345 : vector<8x32xf32>
    %347 = math.exp %346 : vector<8x32xf32>
    %cst_65 = arith.constant 1.000000e+00 : f32
    %348 = vector.broadcast %cst_65 : f32 to vector<8x32xf32>
    %349 = arith.addf %348, %347 : vector<8x32xf32>
    %350 = arith.divf %348, %349 : vector<8x32xf32>
    %351 = vector.extract_strided_slice %341 {offsets = [0, 128], sizes = [8, 32], strides = [1, 1]} : vector<8x384xf32> to vector<8x32xf32>
    %352 = vector.extract_strided_slice %342 {offsets = [0, 128], sizes = [8, 32], strides = [1, 1]} : vector<8x384xf32> to vector<8x32xf32>
    %353 = arith.addf %351, %352 : vector<8x32xf32>
    %354 = arith.negf %353 : vector<8x32xf32>
    %355 = math.exp %354 : vector<8x32xf32>
    %cst_66 = arith.constant 1.000000e+00 : f32
    %356 = vector.broadcast %cst_66 : f32 to vector<8x32xf32>
    %357 = arith.addf %356, %355 : vector<8x32xf32>
    %358 = arith.divf %356, %357 : vector<8x32xf32>
    %359 = vector.extract_strided_slice %341 {offsets = [0, 256], sizes = [8, 32], strides = [1, 1]} : vector<8x384xf32> to vector<8x32xf32>
    %360 = vector.extract_strided_slice %342 {offsets = [0, 256], sizes = [8, 32], strides = [1, 1]} : vector<8x384xf32> to vector<8x32xf32>
    %361 = arith.addf %360, %252 : vector<8x32xf32>
    %362 = arith.mulf %350, %361 : vector<8x32xf32>
    %363 = arith.addf %359, %362 : vector<8x32xf32>
    %364 = math.tanh %363 : vector<8x32xf32>
    %cst_67 = arith.constant 1.000000e+00 : f32
    %365 = vector.broadcast %cst_67 : f32 to vector<8x32xf32>
    %366 = arith.subf %365, %358 : vector<8x32xf32>
    %367 = arith.mulf %366, %364 : vector<8x32xf32>
    %368 = arith.mulf %358, %340 : vector<8x32xf32>
    %369 = arith.addf %367, %368 : vector<8x32xf32>
    %370 = vector.extract_strided_slice %248 {offsets = [32, 0], sizes = [8, 384], strides = [1, 1]} : vector<64x384xf32> to vector<8x384xf32>
    %cst_68 = arith.constant dense<0.000000e+00> : vector<8x384xf32>
    %371 = tpu.matmul %369, %249, %cst_68 {dimension_numbers = #tpu.dot_dimension_numbers<[1], [0], [0], [1], [0, 0, 1, 1], [], []>} : vector<8x32xf32>, vector<32x384xf32>, vector<8x384xf32> -> vector<8x384xf32>
    %372 = vector.extract_strided_slice %370 {offsets = [0, 0], sizes = [8, 32], strides = [1, 1]} : vector<8x384xf32> to vector<8x32xf32>
    %373 = vector.extract_strided_slice %371 {offsets = [0, 0], sizes = [8, 32], strides = [1, 1]} : vector<8x384xf32> to vector<8x32xf32>
    %374 = arith.addf %372, %373 : vector<8x32xf32>
    %375 = arith.negf %374 : vector<8x32xf32>
    %376 = math.exp %375 : vector<8x32xf32>
    %cst_69 = arith.constant 1.000000e+00 : f32
    %377 = vector.broadcast %cst_69 : f32 to vector<8x32xf32>
    %378 = arith.addf %377, %376 : vector<8x32xf32>
    %379 = arith.divf %377, %378 : vector<8x32xf32>
    %380 = vector.extract_strided_slice %370 {offsets = [0, 128], sizes = [8, 32], strides = [1, 1]} : vector<8x384xf32> to vector<8x32xf32>
    %381 = vector.extract_strided_slice %371 {offsets = [0, 128], sizes = [8, 32], strides = [1, 1]} : vector<8x384xf32> to vector<8x32xf32>
    %382 = arith.addf %380, %381 : vector<8x32xf32>
    %383 = arith.negf %382 : vector<8x32xf32>
    %384 = math.exp %383 : vector<8x32xf32>
    %cst_70 = arith.constant 1.000000e+00 : f32
    %385 = vector.broadcast %cst_70 : f32 to vector<8x32xf32>
    %386 = arith.addf %385, %384 : vector<8x32xf32>
    %387 = arith.divf %385, %386 : vector<8x32xf32>
    %388 = vector.extract_strided_slice %370 {offsets = [0, 256], sizes = [8, 32], strides = [1, 1]} : vector<8x384xf32> to vector<8x32xf32>
    %389 = vector.extract_strided_slice %371 {offsets = [0, 256], sizes = [8, 32], strides = [1, 1]} : vector<8x384xf32> to vector<8x32xf32>
    %390 = arith.addf %389, %252 : vector<8x32xf32>
    %391 = arith.mulf %379, %390 : vector<8x32xf32>
    %392 = arith.addf %388, %391 : vector<8x32xf32>
    %393 = math.tanh %392 : vector<8x32xf32>
    %cst_71 = arith.constant 1.000000e+00 : f32
    %394 = vector.broadcast %cst_71 : f32 to vector<8x32xf32>
    %395 = arith.subf %394, %387 : vector<8x32xf32>
    %396 = arith.mulf %395, %393 : vector<8x32xf32>
    %397 = arith.mulf %387, %369 : vector<8x32xf32>
    %398 = arith.addf %396, %397 : vector<8x32xf32>
    %399 = vector.extract_strided_slice %248 {offsets = [40, 0], sizes = [8, 384], strides = [1, 1]} : vector<64x384xf32> to vector<8x384xf32>
    %cst_72 = arith.constant dense<0.000000e+00> : vector<8x384xf32>
    %400 = tpu.matmul %398, %249, %cst_72 {dimension_numbers = #tpu.dot_dimension_numbers<[1], [0], [0], [1], [0, 0, 1, 1], [], []>} : vector<8x32xf32>, vector<32x384xf32>, vector<8x384xf32> -> vector<8x384xf32>
    %401 = vector.extract_strided_slice %399 {offsets = [0, 0], sizes = [8, 32], strides = [1, 1]} : vector<8x384xf32> to vector<8x32xf32>
    %402 = vector.extract_strided_slice %400 {offsets = [0, 0], sizes = [8, 32], strides = [1, 1]} : vector<8x384xf32> to vector<8x32xf32>
    %403 = arith.addf %401, %402 : vector<8x32xf32>
    %404 = arith.negf %403 : vector<8x32xf32>
    %405 = math.exp %404 : vector<8x32xf32>
    %cst_73 = arith.constant 1.000000e+00 : f32
    %406 = vector.broadcast %cst_73 : f32 to vector<8x32xf32>
    %407 = arith.addf %406, %405 : vector<8x32xf32>
    %408 = arith.divf %406, %407 : vector<8x32xf32>
    %409 = vector.extract_strided_slice %399 {offsets = [0, 128], sizes = [8, 32], strides = [1, 1]} : vector<8x384xf32> to vector<8x32xf32>
    %410 = vector.extract_strided_slice %400 {offsets = [0, 128], sizes = [8, 32], strides = [1, 1]} : vector<8x384xf32> to vector<8x32xf32>
    %411 = arith.addf %409, %410 : vector<8x32xf32>
    %412 = arith.negf %411 : vector<8x32xf32>
    %413 = math.exp %412 : vector<8x32xf32>
    %cst_74 = arith.constant 1.000000e+00 : f32
    %414 = vector.broadcast %cst_74 : f32 to vector<8x32xf32>
    %415 = arith.addf %414, %413 : vector<8x32xf32>
    %416 = arith.divf %414, %415 : vector<8x32xf32>
    %417 = vector.extract_strided_slice %399 {offsets = [0, 256], sizes = [8, 32], strides = [1, 1]} : vector<8x384xf32> to vector<8x32xf32>
    %418 = vector.extract_strided_slice %400 {offsets = [0, 256], sizes = [8, 32], strides = [1, 1]} : vector<8x384xf32> to vector<8x32xf32>
    %419 = arith.addf %418, %252 : vector<8x32xf32>
    %420 = arith.mulf %408, %419 : vector<8x32xf32>
    %421 = arith.addf %417, %420 : vector<8x32xf32>
    %422 = math.tanh %421 : vector<8x32xf32>
    %cst_75 = arith.constant 1.000000e+00 : f32
    %423 = vector.broadcast %cst_75 : f32 to vector<8x32xf32>
    %424 = arith.subf %423, %416 : vector<8x32xf32>
    %425 = arith.mulf %424, %422 : vector<8x32xf32>
    %426 = arith.mulf %416, %398 : vector<8x32xf32>
    %427 = arith.addf %425, %426 : vector<8x32xf32>
    %428 = vector.extract_strided_slice %248 {offsets = [48, 0], sizes = [8, 384], strides = [1, 1]} : vector<64x384xf32> to vector<8x384xf32>
    %cst_76 = arith.constant dense<0.000000e+00> : vector<8x384xf32>
    %429 = tpu.matmul %427, %249, %cst_76 {dimension_numbers = #tpu.dot_dimension_numbers<[1], [0], [0], [1], [0, 0, 1, 1], [], []>} : vector<8x32xf32>, vector<32x384xf32>, vector<8x384xf32> -> vector<8x384xf32>
    %430 = vector.extract_strided_slice %428 {offsets = [0, 0], sizes = [8, 32], strides = [1, 1]} : vector<8x384xf32> to vector<8x32xf32>
    %431 = vector.extract_strided_slice %429 {offsets = [0, 0], sizes = [8, 32], strides = [1, 1]} : vector<8x384xf32> to vector<8x32xf32>
    %432 = arith.addf %430, %431 : vector<8x32xf32>
    %433 = arith.negf %432 : vector<8x32xf32>
    %434 = math.exp %433 : vector<8x32xf32>
    %cst_77 = arith.constant 1.000000e+00 : f32
    %435 = vector.broadcast %cst_77 : f32 to vector<8x32xf32>
    %436 = arith.addf %435, %434 : vector<8x32xf32>
    %437 = arith.divf %435, %436 : vector<8x32xf32>
    %438 = vector.extract_strided_slice %428 {offsets = [0, 128], sizes = [8, 32], strides = [1, 1]} : vector<8x384xf32> to vector<8x32xf32>
    %439 = vector.extract_strided_slice %429 {offsets = [0, 128], sizes = [8, 32], strides = [1, 1]} : vector<8x384xf32> to vector<8x32xf32>
    %440 = arith.addf %438, %439 : vector<8x32xf32>
    %441 = arith.negf %440 : vector<8x32xf32>
    %442 = math.exp %441 : vector<8x32xf32>
    %cst_78 = arith.constant 1.000000e+00 : f32
    %443 = vector.broadcast %cst_78 : f32 to vector<8x32xf32>
    %444 = arith.addf %443, %442 : vector<8x32xf32>
    %445 = arith.divf %443, %444 : vector<8x32xf32>
    %446 = vector.extract_strided_slice %428 {offsets = [0, 256], sizes = [8, 32], strides = [1, 1]} : vector<8x384xf32> to vector<8x32xf32>
    %447 = vector.extract_strided_slice %429 {offsets = [0, 256], sizes = [8, 32], strides = [1, 1]} : vector<8x384xf32> to vector<8x32xf32>
    %448 = arith.addf %447, %252 : vector<8x32xf32>
    %449 = arith.mulf %437, %448 : vector<8x32xf32>
    %450 = arith.addf %446, %449 : vector<8x32xf32>
    %451 = math.tanh %450 : vector<8x32xf32>
    %cst_79 = arith.constant 1.000000e+00 : f32
    %452 = vector.broadcast %cst_79 : f32 to vector<8x32xf32>
    %453 = arith.subf %452, %445 : vector<8x32xf32>
    %454 = arith.mulf %453, %451 : vector<8x32xf32>
    %455 = arith.mulf %445, %427 : vector<8x32xf32>
    %456 = arith.addf %454, %455 : vector<8x32xf32>
    %457 = vector.extract_strided_slice %248 {offsets = [56, 0], sizes = [8, 384], strides = [1, 1]} : vector<64x384xf32> to vector<8x384xf32>
    %cst_80 = arith.constant dense<0.000000e+00> : vector<8x384xf32>
    %458 = tpu.matmul %456, %249, %cst_80 {dimension_numbers = #tpu.dot_dimension_numbers<[1], [0], [0], [1], [0, 0, 1, 1], [], []>} : vector<8x32xf32>, vector<32x384xf32>, vector<8x384xf32> -> vector<8x384xf32>
    %459 = vector.extract_strided_slice %457 {offsets = [0, 0], sizes = [8, 32], strides = [1, 1]} : vector<8x384xf32> to vector<8x32xf32>
    %460 = vector.extract_strided_slice %458 {offsets = [0, 0], sizes = [8, 32], strides = [1, 1]} : vector<8x384xf32> to vector<8x32xf32>
    %461 = arith.addf %459, %460 : vector<8x32xf32>
    %462 = arith.negf %461 : vector<8x32xf32>
    %463 = math.exp %462 : vector<8x32xf32>
    %cst_81 = arith.constant 1.000000e+00 : f32
    %464 = vector.broadcast %cst_81 : f32 to vector<8x32xf32>
    %465 = arith.addf %464, %463 : vector<8x32xf32>
    %466 = arith.divf %464, %465 : vector<8x32xf32>
    %467 = vector.extract_strided_slice %457 {offsets = [0, 128], sizes = [8, 32], strides = [1, 1]} : vector<8x384xf32> to vector<8x32xf32>
    %468 = vector.extract_strided_slice %458 {offsets = [0, 128], sizes = [8, 32], strides = [1, 1]} : vector<8x384xf32> to vector<8x32xf32>
    %469 = arith.addf %467, %468 : vector<8x32xf32>
    %470 = arith.negf %469 : vector<8x32xf32>
    %471 = math.exp %470 : vector<8x32xf32>
    %cst_82 = arith.constant 1.000000e+00 : f32
    %472 = vector.broadcast %cst_82 : f32 to vector<8x32xf32>
    %473 = arith.addf %472, %471 : vector<8x32xf32>
    %474 = arith.divf %472, %473 : vector<8x32xf32>
    %475 = vector.extract_strided_slice %457 {offsets = [0, 256], sizes = [8, 32], strides = [1, 1]} : vector<8x384xf32> to vector<8x32xf32>
    %476 = vector.extract_strided_slice %458 {offsets = [0, 256], sizes = [8, 32], strides = [1, 1]} : vector<8x384xf32> to vector<8x32xf32>
    %477 = arith.addf %476, %252 : vector<8x32xf32>
    %478 = arith.mulf %466, %477 : vector<8x32xf32>
    %479 = arith.addf %475, %478 : vector<8x32xf32>
    %480 = math.tanh %479 : vector<8x32xf32>
    %cst_83 = arith.constant 1.000000e+00 : f32
    %481 = vector.broadcast %cst_83 : f32 to vector<8x32xf32>
    %482 = arith.subf %481, %474 : vector<8x32xf32>
    %483 = arith.mulf %482, %480 : vector<8x32xf32>
    %484 = arith.mulf %474, %456 : vector<8x32xf32>
    %485 = arith.addf %483, %484 : vector<8x32xf32>
    %486 = tpu.concatenate %282, %311, %340, %369, %398, %427, %456, %485 in 0 : vector<8x32xf32>, vector<8x32xf32>, vector<8x32xf32>, vector<8x32xf32>, vector<8x32xf32>, vector<8x32xf32>, vector<8x32xf32>, vector<8x32xf32> -> vector<64x32xf32>
    %c0_84 = arith.constant 0 : index
    %c0_85 = arith.constant 0 : index
    %487 = vector.load %arg9[%c0_84, %c0_85] : memref<32x1xf32, #tpu.memory_space<vmem>>, vector<32x1xf32>
    %cst_86 = arith.constant dense<0.000000e+00> : vector<64x1xf32>
    %488 = tpu.matmul %486, %487, %cst_86 {dimension_numbers = #tpu.dot_dimension_numbers<[1], [0], [0], [1], [0, 0, 1, 1], [], []>} : vector<64x32xf32>, vector<32x1xf32>, vector<64x1xf32> -> vector<64x1xf32>
    %c0_87 = arith.constant 0 : index
    %c0_88 = arith.constant 0 : index
    %489 = vector.load %arg10[%c0_87, %c0_88] : memref<1x1xf32, #tpu.memory_space<vmem>>, vector<1x1xf32>
    %490 = vector.broadcast %489 : vector<1x1xf32> to vector<64x1xf32>
    %491 = arith.addf %488, %490 : vector<64x1xf32>
    %c0_89 = arith.constant 0 : index
    %c0_90 = arith.constant 0 : index
    %492 = vector.load %arg11[%c0_89, %c0_90] : memref<64x1xf32, #tpu.memory_space<vmem>>, vector<64x1xf32>
    tpu.vector_store %arg11[%c0_89, %c0_90], %491 {strides = array<i32>} : memref<64x1xf32, #tpu.memory_space<vmem>>, vector<64x1xf32>,
    return
  }
}

</mosaic_0001>

<bundles_post_ra>
// kernel: tpu_custom_call.1
= control target key start
LH: loop header
LB: loop body
LE: loop exit
PB: predicated region body
PF: predicated region fallthrough
CT: control target
= control target key end

     0   :  { %s3573_s0 = inlined_call_operand.vmem [shape: f32[64,32], index: 0, kind: input, shape index: {}]   ;;  %s3574_s1 = inlined_call_operand.vmem [shape: f32[32,384], index: 1, kind: input, shape index: {}]   ;;  %s3575_s2 = inlined_call_operand.hbm [shape: f32[32,384], index: 2, kind: input, shape index: {}]   ;;  %s3576_s3 = inlined_call_operand.hbm [shape: f32[1,384], index: 3, kind: input, shape index: {}]   ;;  %s3577_s4 = inlined_call_operand.vmem [shape: f32[1,32], index: 4, kind: input, shape index: {}]   ;;  %s3578_s5 = inlined_call_operand.hbm [shape: f32[32,384], index: 5, kind: input, shape index: {}]   ;;  %s3579_s6 = inlined_call_operand.hbm [shape: f32[32,384], index: 6, kind: input, shape index: {}]   ;;  %s3580_s7 = inlined_call_operand.vmem [shape: f32[1,384], index: 7, kind: input, shape index: {}]   ;;  %s3581_s8 = inlined_call_operand.vmem [shape: f32[1,32], index: 8, kind: input, shape index: {}]   ;;  %s3582_s9 = inlined_call_operand.vmem [shape: f32[32,1], index: 9, kind: input, shape index: {}]   ;;  %s3583_s10 = inlined_call_operand.<no memory space> [shape: f32[1,1], index: 10, kind: input, shape index: {}]   ;;  %s3584_s11 = inlined_call_operand.vmem [shape: f32[64,1], index: 11, kind: output, shape index: {}]  }
   0x1   :  { %v16_v0 = vstv %s3583_s10 }
   0x2   :  { %17 = vst [vmem:[#allocation2] sm:$0x1] %v16_v0 }
   0x3   :  { %18 = vsyncpa [#allocation4], 0 }
   0x4   :  { %19 = vsyncpa [#allocation6], 0  ;;  %s43_s21 = sshll.u32 %s3576_s3, 4  ;;  %s44_s21 = int_to_ptr.hbm [resolvable:$true] %s43_s21 }
   0x5   :  { %20 = vsyncpa [#allocation9], 0  ;;  %s2712_s22 = smov [#allocation5]   ;;  %s29_s26 = sshll.u32 %s3575_s2, 4  ;;  %s30_s26 = int_to_ptr.hbm [resolvable:$true] %s29_s26 }
   0x6   :  { %s45_s23 = sshll.u32 %s2712_s22, 4  ;;  %s2713_s27 = smov [#allocation3]   ;;  %s46_s23 = int_to_ptr.vmem [resolvable:$true] %s45_s23 }
   0x7   :  { %48 = dma.hbm_to_vmem [thread:$0]  %s44_s21, 48, %s46_s23, [#allocation6]  }
   0x8   :  { %s31_s10 = sshll.u32 %s2713_s27, 4  ;;  %s2714_s28 = smov 384   ;;  %s32_s10 = int_to_ptr.vmem [resolvable:$true] %s31_s10 }
   0x9   :  { %s2715_s29 = smov 24   ;;  %s55_s3 = sshll.u32 %s3578_s5, 4  ;;  %s56_s3 = int_to_ptr.hbm [resolvable:$true] %s55_s3 }
   0xa   :  { %37 = dma.hbm_to_vmem [thread:$0]  %s30_s26, 1536, %s32_s10, [#allocation4], %s2714_s28, %s2714_s28, %s2715_s29  }
   0xb   :  { %s2716_s13 = smov [#allocation7]   ;;  %s68_s2 = sshll.u32 %s3579_s6, 4  ;;  %s69_s2 = int_to_ptr.hbm [resolvable:$true] %s68_s2 }
   0xc   :  { %s57_s14 = sshll.u32 %s2716_s13, 4  ;;  %s2717_s17 = smov [#allocation8]   ;;  %s58_s14 = int_to_ptr.vmem [resolvable:$true] %s57_s14 }
   0xd   :  { %63 = dma.hbm_to_vmem [thread:$0]  %s56_s3, 1536, %s58_s14, [#allocation6], %s2714_s28, %s2714_s28, %s2715_s29  }
   0xe   :  { %s70_s18 = sshll.u32 %s2717_s17, 4  ;;  %s71_s18 = int_to_ptr.vmem [resolvable:$true] %s70_s18 }
   0xf   :  { %76 = dma.hbm_to_vmem [thread:$0]  %s69_s2, 1536, %s71_s18, [#allocation9], %s2714_s28, %s2714_s28, %s2715_s29  }
  0x10   :  { %2706 = dma.done.wait [#allocation4], 1536  }
  0x11   :  { %2707 = vsyncadd [#allocation4], 4294965760 }
  0x12   :  { %2708 = dma.done.wait [#allocation6], 1584  }
  0x13   :  { %2709 = vsyncadd [#allocation6], 4294965712 }
  0x14   :  { %2710 = dma.done.wait [#allocation9], 1536  }
  0x15   :  { %2711 = vsyncadd [#allocation9], 4294965760  ;;  %v118_v1 = vld [vmem:[%s3574_s1 + $0x48] sm:$0xff]  ;;  %v115_v2 = vld [vmem:[%s3574_s1 + $0x30] sm:$0xff]  ;;  %vm129_vm0 = vcmask 261120   ;;  %v2718_v32 = vmov 0.0  }
  0x16   :  { %2428 = vmatpush.msra.mxu3 %v118_v1  ;;  %2426 = vmatpush.msra.mxu1 %v118_v1  ;;  %v112_v3 = vld [vmem:[%s3574_s1 + $0x18] sm:$0xff]  ;;  %v109_v4 = vld [vmem:[%s3574_s1] sm:$0xff]  ;;  %v2809_v5 = vld [vmem:[%s3573_s0 + $0x30] sm:$0xff] }
  0x17   :  { %166 = vmatpush.msra.mxu0 %v118_v1  ;;  %2427 = vmatpush.msra.mxu2 %v118_v1  ;;  %v2814_v6 = vld [vmem:[%s3573_s0 + $0x10] sm:$0xff]  ;;  %v116_v10 = vld [vmem:[%s3574_s1 + $0x38] sm:$0xff]  ;;  %v101_v11 = vld [vmem:[%s3573_s0] sm:$0xff] }
  0x18   :  { %2431 = vmatpush.msra.mxu3 %v115_v2  ;;  %2429 = vmatpush.msra.mxu1 %v115_v2  ;;  %v2816_v7 = vld [vmem:[#allocation3 + $0x48] sm:$0xff]  ;;  %v2823_v9 = vld [vmem:[#allocation3 + $0x30] sm:$0xff]  ;;  %v2837_v12 = vld [vmem:[%s3573_s0 + $0x20] sm:$0xff] }
  0x19   :  { %167 = vmatpush.msra.mxu0 %v115_v2  ;;  %2430 = vmatpush.msra.mxu2 %v115_v2  ;;  %v119_v8 = vld [vmem:[%s3574_s1 + $0x50] sm:$0xff]  ;;  %v2839_v13 = vld [vmem:[#allocation3 + $0x18] sm:$0xff]  ;;  %v2848_v16 = vld [vmem:[#allocation3] sm:$0xff] }
  0x1a   :  { %2434 = vmatpush.msra.mxu3 %v112_v3  ;;  %2432 = vmatpush.msra.mxu1 %v112_v3  ;;  %v113_v14 = vld [vmem:[%s3574_s1 + $0x20] sm:$0xff]  ;;  %v120_v15 = vld [vmem:[%s3574_s1 + $0x58] sm:$0xff]  ;;  %v110_v17 = vld [vmem:[%s3574_s1 + $0x8] sm:$0xff] }
  0x1b   :  { %168 = vmatpush.msra.mxu0 %v112_v3  ;;  %2433 = vmatpush.msra.mxu2 %v112_v3  ;;  %v2859_v18 = vld [vmem:[%s3573_s0 + $0x38] sm:$0xff]  ;;  %v117_v22 = vld [vmem:[%s3574_s1 + $0x40] sm:$0xff]  ;;  %v114_v24 = vld [vmem:[%s3574_s1 + $0x28] sm:$0xff] }
  0x1c   :  { %2437 = vmatpush.msra.mxu3 %v109_v4  ;;  %2435 = vmatpush.msra.mxu1 %v109_v4  ;;  %v2865_v19 = vld [vmem:[%s3573_s0 + $0x18] sm:$0xff]  ;;  %v2889_v25 = vld [vmem:[%s3573_s0 + $0x28] sm:$0xff]  ;;  %v111_v28 = vld [vmem:[%s3574_s1 + $0x10] sm:$0xff] }
  0x1d   :  { %2302 = vmatmul.msk.f32.vlgmr.msra.gmra.mxu3 %vm129_vm0, %v2809_v5  ;;  %2298 = vmatmul.msk.f32.vlgmr.msra.gmra.mxu1 %vm129_vm0, %v2814_v6  ;;  %v2867_v20 = vld [vmem:[#allocation3 + $0x58] sm:$0xff]  ;;  %v2869_v21 = vld [vmem:[#allocation3 + $0x50] sm:$0xff]  ;;  %v2891_v26 = vld [vmem:[#allocation3 + $0x40] sm:$0xff] }
  0x1e   :  { %308 = vmatpush.msrb.mxu3 %v2816_v7  ;;  %207 = vmatpush.msrb.mxu1 %v119_v8  ;;  %v2878_v23 = vld [vmem:[#allocation3 + $0x38] sm:$0xff]  ;;  %v2893_v27 = vld [vmem:[#allocation3 + $0x20] sm:$0xff]  ;;  %v2901_v29 = vld [vmem:[#allocation3 + $0x28] sm:$0xff] }
  0x1f   :  { %169 = vmatpush.msra.mxu0 %v109_v4  ;;  %2436 = vmatpush.msra.mxu2 %v109_v4  ;;  %v2903_v30 = vld [vmem:[#allocation3 + $0x8] sm:$0xff]  ;;  %v2909_v31 = vld [vmem:[#allocation3 + $0x10] sm:$0xff]  ;;  %v121_v35 = vld [vmem:[#allocation5] sm:$0x7] }
  0x20   :  { %309 = vmatpush.msrb.mxu3 %v2823_v9  ;;  %208 = vmatpush.msrb.mxu1 %v116_v10  ;;  %v2957_v39 = vperm.slane %v121_v35, 0  ;;  %v2960_v43 = vperm.slane %v121_v35, 1  ;;  %v102_v53 = vld [vmem:[%s3573_s0 + $0x8] sm:$0xff]  ;;  %v2976_v59 = vld [vmem:[%s3577_s4] ss:$0 sm:$0xff]  ;;  %v2982_v1 = vperm.slane %v121_v35, 2 }
  0x21   :  { %2296 = vmatmul.msk.f32.vlgmr.msra.gmra.mxu0 %vm129_vm0, %v101_v11  ;;  %2300 = vmatmul.msk.f32.vlgmr.msra.gmra.mxu2 %vm129_vm0, %v2837_v12 }
  0x22   :  { %310 = vmatpush.msrb.mxu3 %v2839_v13  ;;  %209 = vmatpush.msrb.mxu1 %v113_v14 }
  0x23   :  { %248 = vmatpush.msrb.mxu2 %v120_v15  ;;  %570 = vmatpush.msrb.mxu0 %v2867_v20 }
  0x24   :  { %311 = vmatpush.msrb.mxu3 %v2848_v16  ;;  %210 = vmatpush.msrb.mxu1 %v110_v17 }
  0x25   :  { %2303 = vmatmul.msk.f32.gmra.mxu3 %vm129_vm0, %v2859_v18  ;;  %2299 = vmatmul.msk.f32.gmra.mxu1 %vm129_vm0, %v2865_v19 }
  0x26   :  { %328 = vmatpush.msra.mxu3 %v2869_v21  ;;  %249 = vmatpush.msrb.mxu2 %v117_v22 }
  0x27   :  { %571 = vmatpush.msrb.mxu0 %v2891_v26  ;;  %641 = vmatpush.msra.mxu1 %v2816_v7 }
  0x28   :  { %329 = vmatpush.msra.mxu3 %v2878_v23  ;;  %250 = vmatpush.msrb.mxu2 %v114_v24 }
  0x29   :  { %2301 = vmatmul.msk.f32.gmra.mxu2 %vm129_vm0, %v2889_v25  ;;  %572 = vmatpush.msrb.mxu0 %v2901_v29 }
  0x2a   :  { %330 = vmatpush.msra.mxu3 %v2893_v27  ;;  %251 = vmatpush.msrb.mxu2 %v111_v28 }
  0x2b   :  { %573 = vmatpush.msrb.mxu0 %v2909_v31  ;;  %642 = vmatpush.msra.mxu1 %v2823_v9 }
  0x2c   :  { %661 = vmatpush.msra.mxu2 %v2869_v21  ;;  %331 = vmatpush.msra.mxu3 %v2903_v30 }
  0x2d   :  { %312 = vmatmul.f32.vlgmr.msrb.gmra.mxu3 %v2718_v32  ;;  %2304 = vmatmul.msk.f32.vlgmr.msrb.gmra.mxu1 %vm129_vm0, %v101_v11 }
  0x2e   :  { %348 = vmatpush.msrb.mxu3 %v2867_v20  ;;  %662 = vmatpush.msra.mxu2 %v2878_v23 }
  0x2f   :  { %643 = vmatpush.msra.mxu1 %v2839_v13  ;;  %752 = vmatpush.msra.mxu0 %v2816_v7 }
  0x30   :  { %349 = vmatpush.msrb.mxu3 %v2891_v26  ;;  %663 = vmatpush.msra.mxu2 %v2893_v27 }
  0x31   :  { %2312 = vmatmul.msk.f32.vlgmr.msrb.gmra.mxu2 %vm129_vm0, %v101_v11  ;;  %644 = vmatpush.msra.mxu1 %v2848_v16 }
  0x32   :  { %350 = vmatpush.msrb.mxu3 %v2901_v29  ;;  %664 = vmatpush.msra.mxu2 %v2903_v30 }
  0x33   :  { %772 = vmatpush.msrb.mxu1 %v2869_v21  ;;  %753 = vmatpush.msra.mxu0 %v2823_v9 }
  0x34   :  { %792 = vmatpush.msrb.mxu2 %v2867_v20  ;;  %351 = vmatpush.msrb.mxu3 %v2909_v31 }
  0x35   :  { %332 = vmatmul.f32.vlgmr.msra.gmra.mxu3 %v2718_v32  ;;  %773 = vmatpush.msrb.mxu1 %v2878_v23 }
  0x36   :  { %419 = vmatpush.msra.mxu3 %v2816_v7  ;;  %793 = vmatpush.msrb.mxu2 %v2891_v26 }
  0x37   :  { %754 = vmatpush.msra.mxu0 %v2839_v13  ;;  %774 = vmatpush.msrb.mxu1 %v2893_v27 }
  0x38   :  { %420 = vmatpush.msra.mxu3 %v2823_v9  ;;  %794 = vmatpush.msrb.mxu2 %v2901_v29 }
  0x39   :  { %755 = vmatpush.msra.mxu0 %v2848_v16  ;;  %775 = vmatpush.msrb.mxu1 %v2903_v30 }
  0x3a   :  { %421 = vmatpush.msra.mxu3 %v2839_v13  ;;  %795 = vmatpush.msrb.mxu2 %v2909_v31 }
  0x3b   :  { %2297 = vmatmul.msk.f32.gmra.mxu0 %vm129_vm0, %v102_v53  ;;  %2305 = vmatmul.msk.f32.gmra.mxu1 %vm129_vm0, %v102_v53 }
  0x3c   :  { %422 = vmatpush.msra.mxu3 %v2848_v16  ;;  %2313 = vmatmul.msk.f32.gmra.mxu2 %vm129_vm0, %v102_v53 }
  0x3d   :  { %352 = vmatmul.f32.vlgmr.msrb.gmra.mxu3 %v2718_v32 }
  0x3e   :  { %439 = vmatpush.msrb.mxu3 %v2869_v21 }
  0x40   :  { %440 = vmatpush.msrb.mxu3 %v2878_v23 }
  0x42   :  { %441 = vmatpush.msrb.mxu3 %v2893_v27 }
  0x43   :  { %2306 = vmatmul.msk.f32.gmra.mxu1 %vm129_vm0, %v2814_v6 }
  0x44   :  { %442 = vmatpush.msrb.mxu3 %v2903_v30  ;;  %2314 = vmatmul.msk.f32.gmra.mxu2 %vm129_vm0, %v2814_v6 }
  0x4b   :  { %2307 = vmatmul.msk.f32.gmra.mxu1 %vm129_vm0, %v2865_v19 }
  0x4c   :  { %2315 = vmatmul.msk.f32.gmra.mxu2 %vm129_vm0, %v2865_v19 }
  0x53   :  { %2308 = vmatmul.msk.f32.gmra.mxu1 %vm129_vm0, %v2837_v12 }
  0x54   :  { %2316 = vmatmul.msk.f32.gmra.mxu2 %vm129_vm0, %v2837_v12 }
  0x5b   :  { %2309 = vmatmul.msk.f32.gmra.mxu1 %vm129_vm0, %v2889_v25 }
  0x5c   :  { %2317 = vmatmul.msk.f32.gmra.mxu2 %vm129_vm0, %v2889_v25 }
  0x63   :  { %2310 = vmatmul.msk.f32.gmra.mxu1 %vm129_vm0, %v2809_v5 }
  0x64   :  { %2318 = vmatmul.msk.f32.gmra.mxu2 %vm129_vm0, %v2809_v5 }
  0x6b   :  { %2311 = vmatmul.msk.f32.gmra.mxu1 %vm129_vm0, %v2859_v18 }
  0x6c   :  { %2319 = vmatmul.msk.f32.gmra.mxu2 %vm129_vm0, %v2859_v18 }
  0x9a   :  { %v2949_v33 = vpop.f32.mrf.mxu1 }
  0x9e   :  { %v171_v38 = vpop.f32.mrf.mxu0 }
  0x9f   :  { %v172_v40 = vadd.f32 %v171_v38, %v2957_v39 }
  0xa0   :  { %v2951_v34 = vpop.f32.mrf.mxu3 }
  0xa2   :  { %v2955_v37 = vpop.f32.mrf.mxu1 }
  0xa4   :  { %v2963_v47 = vpop.f32.mrf.mxu2 }
  0xa8   :  { %v2953_v36 = vpop.f32.mrf.mxu3 }
  0xaa   :  { %v212_v44 = vpop.f32.mrf.mxu1 }
  0xab   :  { %v213_v46 = vadd.f32 %v212_v44, %v2960_v43 }
  0xac   :  { %v2970_v54 = vpop.f32.mrf.mxu2 }
  0xb0   :  { %v313_v41 = vpop.f32.mrf.mxu3 }
  0xb1   :  { %v356_v42 = vadd.f32 %v313_v41, %v172_v40 }
  0xb3   :  { %v2320_v45 = vmul.f32 -1.442695, %v356_v42 }
  0xb4   :  { %v253_v2 = vpop.f32.mrf.mxu2 }
  0xb5   :  { %2448 = vpow2.f32 %v2320_v45  ;;  %v254_v15 = vadd.f32 %v253_v2, %v2982_v1 }
  0xb8   :  { %v333_v48 = vpop.f32.mrf.mxu3  ;;  %v174_v5 = vpop.f32.mrf.mxu0 }
  0xb9   :  { %v376_v49 = vadd.f32 %v333_v48, %v213_v46  ;;  %v175_v12 = vadd.f32 %v174_v5, %v2957_v39 }
  0xbb   :  { %v2449_v50 = vpop.eup %2448  ;;  %v2321_v51 = vmul.f32 -1.442695, %v376_v49 }
  0xbc   :  { %v360_v52 = vadd.f32 1.0, %v2449_v50 }
  0xbd   :  { %2450 = vpow2.f32 %v2321_v51  ;;  %v215_v51 = vpop.f32.mrf.mxu1 }
  0xbe   :  { %2452 = vrcp.f32 %v360_v52  ;;  %v372_v62 = vand.u32 2147483648, %v360_v52  ;;  %v370_v0 = vand.u32 2147483647, %v360_v52  ;;  %vm366_vm2 = vweird.f32 %v360_v52 }
  0xbf   :  { %v216_v53 = vadd.f32 %v215_v51, %v2960_v43 }
  0xc0   :  { %v353_v61 = vpop.f32.mrf.mxu3  ;;  %v373_v10 = vor.u32 1.1754944e-38, %v372_v62  ;;  %vm371_vm4 = vcmp.eq.f32.partialorder %v370_v0, 8.507059e+37 }
  0xc1   :  { %v396_v4 = vadd.f32 %v2976_v59, %v353_v61 }
  0xc3   :  { %v2451_v55 = vpop.eup %2450 }
  0xc4   :  { %v2453_v56 = vpop.eup %2452  ;;  %v380_v57 = vadd.f32 1.0, %v2451_v55 }
  0xc5   :  { %v362_v58 = vmul.f32 %v2453_v56, %v360_v52  ;;  %vm367_vm1 = vweird.f32 %v2453_v56 }
  0xc6   :  { %2454 = vrcp.f32 %v380_v57  ;;  %vm368_vm3 = vmor %vm366_vm2, %vm367_vm1  ;;  %v392_v24 = vand.u32 2147483648, %v380_v57  ;;  %v390_v35 = vand.u32 2147483647, %v380_v57  ;;  %vm386_vm6 = vweird.f32 %v380_v57 }
  0xc7   :  { %v363_v60 = vsub.f32 1.0, %v362_v58 }
  0xc8   :  { %v393_v41 = vor.u32 1.1754944e-38, %v392_v24  ;;  %vm391_vm8 = vcmp.eq.f32.partialorder %v390_v35, 8.507059e+37 }
  0xc9   :  { %v364_v63 = vmul.f32 %v2453_v56, %v363_v60 }
  0xcb   :  { %v365_v3 = vadd.f32 %v2453_v56, %v364_v63 }
  0xcc   :  { %v2455_v8 = vpop.eup %2454 }
  0xcd   :  { %v382_v11 = vmul.f32 %v2455_v8, %v380_v57  ;;  %v369_v14 = vsel %vm368_vm3, %v2453_v56, %v365_v3  ;;  %vm387_vm5 = vweird.f32 %v2455_v8 }
  0xce   :  { %v374_v17 = vsel %vm371_vm4, %v373_v10, %v369_v14  ;;  %vm388_vm7 = vmor %vm386_vm6, %vm387_vm5 }
  0xcf   :  { %v383_v6 = vsub.f32 1.0, %v382_v11  ;;  %v397_v22 = vmul.f32 %v396_v4, %v374_v17 }
  0xd1   :  { %v384_v28 = vmul.f32 %v2455_v8, %v383_v6  ;;  %v398_v38 = vadd.f32 %v397_v22, %v254_v15 }
  0xd3   :  { %v385_v40 = vadd.f32 %v2455_v8, %v384_v28  ;;  %2456 = vtanh.f32 %v398_v38 }
  0xd5   :  { %v389_v42 = vsel %vm388_vm7, %v2455_v8, %v385_v40  ;;  %v256_v8 = vpop.f32.mrf.mxu2 }
  0xd6   :  { %v394_v44 = vsel %vm391_vm8, %v393_v41, %v389_v42  ;;  %v257_v17 = vadd.f32 %v256_v8, %v2982_v1 }
  0xd7   :  { %v400_v45 = vsub.f32 1.0, %v394_v44  ;;  %v402_v48 = vmul.f32 0.0, %v394_v44 }
  0xd9   :  { %v2457_v19 = vpop.eup %2456 }
  0xda   :  { %v401_v46 = vmul.f32 %v2457_v19, %v400_v45 }
  0xdc   :  { %v2994_v49 = vadd.f32 %v402_v48, %v401_v46 }
  0xde   :  { %2322 = vmatmul.msk.f32.vlgmr.msra.gmra.mxu3 %vm129_vm0, %v2994_v49 }
  0xdf   :  { %459 = vmatpush.msra.mxu3 %v2867_v20 }
  0xe1   :  { %460 = vmatpush.msra.mxu3 %v2891_v26 }
  0xe3   :  { %461 = vmatpush.msra.mxu3 %v2901_v29 }
  0xe5   :  { %462 = vmatpush.msra.mxu3 %v2909_v31 }
  0xe6   :  { %2323 = vmatmul.msk.f32.vlgmr.msrb.gmra.mxu3 %vm129_vm0, %v2994_v49 }
  0xe7   :  { %530 = vmatpush.msrb.mxu3 %v2816_v7 }
  0xe9   :  { %531 = vmatpush.msrb.mxu3 %v2823_v9 }
  0xeb   :  { %532 = vmatpush.msrb.mxu3 %v2839_v13 }
  0xed   :  { %533 = vmatpush.msrb.mxu3 %v2848_v16 }
  0xee   :  { %2324 = vmatmul.msk.f32.vlgmr.msra.gmra.mxu3 %vm129_vm0, %v2994_v49 }
  0xef   :  { %550 = vmatpush.msra.mxu3 %v2869_v21 }
  0xf1   :  { %551 = vmatpush.msra.mxu3 %v2878_v23 }
  0xf3   :  { %552 = vmatpush.msra.mxu3 %v2893_v27 }
  0xf5   :  { %553 = vmatpush.msra.mxu3 %v2903_v30 }
 0x161   :  { %v424_v25 = vpop.f32.mrf.mxu3 }
 0x162   :  { %v467_v50 = vadd.f32 %v424_v25, %v175_v12 }
 0x164   :  { %v2325_v52 = vmul.f32 -1.442695, %v467_v50 }
 0x166   :  { %2458 = vpow2.f32 %v2325_v52  ;;  %v178_v52 = vadd.f32 %v2949_v33, %v2957_v39 }
 0x169   :  { %v444_v55 = vpop.f32.mrf.mxu3 }
 0x16a   :  { %v487_v56 = vadd.f32 %v444_v55, %v216_v53 }
 0x16c   :  { %v2459_v57 = vpop.eup %2458  ;;  %v2326_v18 = vmul.f32 -1.442695, %v487_v56  ;;  %v218_v56 = vpop.f32.mrf.mxu1 }
 0x16d   :  { %v471_v58 = vadd.f32 1.0, %v2459_v57 }
 0x16e   :  { %2460 = vpow2.f32 %v2326_v18  ;;  %v219_v18 = vadd.f32 %v218_v56, %v2960_v43 }
 0x16f   :  { %2462 = vrcp.f32 %v471_v58  ;;  %v483_v2 = vand.u32 2147483648, %v471_v58  ;;  %v481_v4 = vand.u32 2147483647, %v471_v58  ;;  %vm477_vm10 = vweird.f32 %v471_v58 }
 0x171   :  { %v464_v10 = vpop.f32.mrf.mxu3  ;;  %v484_v15 = vor.u32 1.1754944e-38, %v483_v2  ;;  %vm482_vm12 = vcmp.eq.f32.partialorder %v481_v4, 8.507059e+37 }
 0x172   :  { %v507_v24 = vadd.f32 %v2976_v59, %v464_v10 }
 0x174   :  { %v2461_v60 = vpop.eup %2460 }
 0x175   :  { %v2463_v61 = vpop.eup %2462  ;;  %v491_v62 = vadd.f32 1.0, %v2461_v60 }
 0x176   :  { %v473_v63 = vmul.f32 %v2463_v61, %v471_v58  ;;  %vm478_vm9 = vweird.f32 %v2463_v61 }
 0x177   :  { %2464 = vrcp.f32 %v491_v62  ;;  %vm479_vm11 = vmor %vm477_vm10, %vm478_vm9  ;;  %v503_v40 = vand.u32 2147483648, %v491_v62  ;;  %v501_v42 = vand.u32 2147483647, %v491_v62  ;;  %vm497_vm14 = vweird.f32 %v491_v62 }
 0x178   :  { %v474_v0 = vsub.f32 1.0, %v473_v63 }
 0x179   :  { %v504_v19 = vor.u32 1.1754944e-38, %v503_v40  ;;  %vm502_vm1 = vcmp.eq.f32.partialorder %v501_v42, 8.507059e+37 }
 0x17a   :  { %v475_v3 = vmul.f32 %v2463_v61, %v474_v0 }
 0x17c   :  { %v476_v11 = vadd.f32 %v2463_v61, %v475_v3 }
 0x17d   :  { %v2465_v14 = vpop.eup %2464 }
 0x17e   :  { %v493_v6 = vmul.f32 %v2465_v14, %v491_v62  ;;  %v480_v22 = vsel %vm479_vm11, %v2463_v61, %v476_v11  ;;  %vm498_vm13 = vweird.f32 %v2465_v14 }
 0x17f   :  { %v485_v28 = vsel %vm482_vm12, %v484_v15, %v480_v22  ;;  %vm499_vm15 = vmor %vm497_vm14, %vm498_vm13  ;;  %v259_v15 = vpop.f32.mrf.mxu2 }
 0x180   :  { %v494_v35 = vsub.f32 1.0, %v493_v6  ;;  %v508_v38 = vmul.f32 %v507_v24, %v485_v28 }
 0x182   :  { %v495_v41 = vmul.f32 %v2465_v14, %v494_v35  ;;  %v509_v44 = vadd.f32 %v508_v38, %v257_v17  ;;  %v260_v35 = vadd.f32 %v259_v15, %v2982_v1 }
 0x184   :  { %v496_v45 = vadd.f32 %v2465_v14, %v495_v41  ;;  %2466 = vtanh.f32 %v509_v44 }
 0x186   :  { %v500_v46 = vsel %vm499_vm15, %v2465_v14, %v496_v45 }
 0x187   :  { %v505_v48 = vsel %vm502_vm1, %v504_v19, %v500_v46 }
 0x188   :  { %v511_v5 = vsub.f32 1.0, %v505_v48  ;;  %v513_v50 = vmul.f32 %v505_v48, %v2994_v49 }
 0x18a   :  { %v2467_v12 = vpop.eup %2466 }
 0x18b   :  { %v512_v25 = vmul.f32 %v2467_v12, %v511_v5 }
 0x18d   :  { %v3031_v51 = vadd.f32 %v513_v50, %v512_v25 }
 0x18f   :  { %2327 = vmatmul.msk.f32.vlgmr.msrb.gmra.mxu3 %vm129_vm0, %v3031_v51  ;;  %2329 = vmatmul.msk.f32.vlgmr.msrb.gmra.mxu0 %vm129_vm0, %v3031_v51 }
 0x190   :  { %681 = vmatpush.msrb.mxu3 %v2867_v20  ;;  %883 = vmatpush.msrb.mxu0 %v2869_v21 }
 0x192   :  { %682 = vmatpush.msrb.mxu3 %v2891_v26  ;;  %884 = vmatpush.msrb.mxu0 %v2878_v23 }
 0x194   :  { %683 = vmatpush.msrb.mxu3 %v2901_v29  ;;  %885 = vmatpush.msrb.mxu0 %v2893_v27 }
 0x196   :  { %684 = vmatpush.msrb.mxu3 %v2909_v31  ;;  %886 = vmatpush.msrb.mxu0 %v2903_v30 }
 0x197   :  { %2328 = vmatmul.msk.f32.vlgmr.msra.gmra.mxu3 %vm129_vm0, %v3031_v51 }
 0x198   :  { %863 = vmatpush.msra.mxu3 %v2816_v7 }
 0x19a   :  { %864 = vmatpush.msra.mxu3 %v2823_v9 }
 0x19c   :  { %865 = vmatpush.msra.mxu3 %v2839_v13 }
 0x19e   :  { %866 = vmatpush.msra.mxu3 %v2848_v16 }
 0x20c   :  { %v575_v10 = vpop.f32.mrf.mxu0 }
 0x20d   :  { %v618_v22 = vadd.f32 %v2976_v59, %v575_v10 }
 0x212   :  { %v535_v53 = vpop.f32.mrf.mxu3 }
 0x213   :  { %v578_v55 = vadd.f32 %v535_v53, %v178_v52 }
 0x215   :  { %v2330_v57 = vmul.f32 -1.442695, %v578_v55 }
 0x217   :  { %2468 = vpow2.f32 %v2330_v57  ;;  %v221_v57 = vpop.f32.mrf.mxu1 }
 0x21a   :  { %v555_v58 = vpop.f32.mrf.mxu3 }
 0x21b   :  { %v598_v60 = vadd.f32 %v555_v58, %v219_v18  ;;  %v262_v18 = vpop.f32.mrf.mxu2 }
 0x21d   :  { %v2469_v61 = vpop.eup %2468  ;;  %v2331_v62 = vmul.f32 -1.442695, %v598_v60 }
 0x21e   :  { %v582_v63 = vadd.f32 1.0, %v2469_v61 }
 0x21f   :  { %2470 = vpow2.f32 %v2331_v62  ;;  %v3077_v58 = vpop.f32.mrf.mxu1 }
 0x220   :  { %2472 = vrcp.f32 %v582_v63  ;;  %v594_v8 = vand.u32 2147483648, %v582_v63  ;;  %v592_v14 = vand.u32 2147483647, %v582_v63  ;;  %vm588_vm3 = vweird.f32 %v582_v63 }
 0x222   :  { %v595_v24 = vor.u32 1.1754944e-38, %v594_v8  ;;  %vm593_vm5 = vcmp.eq.f32.partialorder %v592_v14, 8.507059e+37 }
 0x223   :  { %v3079_v60 = vpop.f32.mrf.mxu2 }
 0x225   :  { %v2471_v0 = vpop.eup %2470 }
 0x226   :  { %v2473_v2 = vpop.eup %2472  ;;  %v602_v3 = vadd.f32 1.0, %v2471_v0 }
 0x227   :  { %v584_v4 = vmul.f32 %v2473_v2, %v582_v63  ;;  %vm589_vm2 = vweird.f32 %v2473_v2  ;;  %v3081_v61 = vpop.f32.mrf.mxu1 }
 0x228   :  { %2474 = vrcp.f32 %v602_v3  ;;  %vm590_vm4 = vmor %vm588_vm3, %vm589_vm2  ;;  %v614_v44 = vand.u32 2147483648, %v602_v3  ;;  %v612_v19 = vand.u32 2147483647, %v602_v3  ;;  %vm608_vm7 = vweird.f32 %v602_v3 }
 0x229   :  { %v585_v33 = vsub.f32 1.0, %v584_v4  ;;  %v181_v4 = vadd.f32 %v2955_v37, %v2957_v39 }
 0x22a   :  { %v615_v5 = vor.u32 1.1754944e-38, %v614_v44  ;;  %vm613_vm9 = vcmp.eq.f32.partialorder %v612_v19, 8.507059e+37 }
 0x22b   :  { %v586_v11 = vmul.f32 %v2473_v2, %v585_v33  ;;  %v3083_v62 = vpop.f32.mrf.mxu2 }
 0x22d   :  { %v587_v17 = vadd.f32 %v2473_v2, %v586_v11  ;;  %v222_v11 = vadd.f32 %v221_v57, %v2960_v43 }
 0x22e   :  { %v2475_v6 = vpop.eup %2474 }
 0x22f   :  { %v604_v28 = vmul.f32 %v2475_v6, %v602_v3  ;;  %v591_v38 = vsel %vm590_vm4, %v2473_v2, %v587_v17  ;;  %vm609_vm6 = vweird.f32 %v2475_v6  ;;  %v3085_v63 = vpop.f32.mrf.mxu1 }
 0x230   :  { %v596_v40 = vsel %vm593_vm5, %v595_v24, %v591_v38  ;;  %vm610_vm8 = vmor %vm608_vm7, %vm609_vm6 }
 0x231   :  { %v605_v41 = vsub.f32 1.0, %v604_v28  ;;  %v619_v42 = vmul.f32 %v618_v22, %v596_v40 }
 0x233   :  { %v606_v45 = vmul.f32 %v2475_v6, %v605_v41  ;;  %v620_v46 = vadd.f32 %v619_v42, %v260_v35  ;;  %v3087_v0 = vpop.f32.mrf.mxu2 }
 0x235   :  { %v607_v48 = vadd.f32 %v2475_v6, %v606_v45  ;;  %2476 = vtanh.f32 %v620_v46 }
 0x237   :  { %v611_v12 = vsel %vm610_vm8, %v2475_v6, %v607_v48  ;;  %v3089_v2 = vpop.f32.mrf.mxu1 }
 0x238   :  { %v616_v25 = vsel %vm613_vm9, %v615_v5, %v611_v12 }
 0x239   :  { %v622_v50 = vsub.f32 1.0, %v616_v25  ;;  %v624_v55 = vmul.f32 %v616_v25, %v3031_v51 }
 0x23b   :  { %v2477_v52 = vpop.eup %2476  ;;  %v3091_v3 = vpop.f32.mrf.mxu2 }
 0x23c   :  { %v623_v53 = vmul.f32 %v2477_v52, %v622_v50  ;;  %v263_v50 = vadd.f32 %v262_v18, %v2982_v1 }
 0x23e   :  { %v3057_v56 = vadd.f32 %v624_v55, %v623_v53 }
 0x240   :  { %2332 = vmatmul.msk.f32.vlgmr.msra.gmra.mxu1 %vm129_vm0, %v3057_v56  ;;  %2333 = vmatmul.msk.f32.vlgmr.msra.gmra.mxu2 %vm129_vm0, %v3057_v56 }
 0x241   :  { %2334 = vmatmul.msk.f32.vlgmr.msrb.gmra.mxu3 %vm129_vm0, %v3057_v56  ;;  %903 = vmatpush.msra.mxu1 %v2867_v20 }
 0x242   :  { %974 = vmatpush.msra.mxu2 %v2816_v7  ;;  %994 = vmatpush.msrb.mxu3 %v2869_v21 }
 0x243   :  { %904 = vmatpush.msra.mxu1 %v2891_v26 }
 0x244   :  { %975 = vmatpush.msra.mxu2 %v2823_v9  ;;  %995 = vmatpush.msrb.mxu3 %v2878_v23 }
 0x245   :  { %905 = vmatpush.msra.mxu1 %v2901_v29 }
 0x246   :  { %976 = vmatpush.msra.mxu2 %v2839_v13  ;;  %996 = vmatpush.msrb.mxu3 %v2893_v27 }
 0x247   :  { %906 = vmatpush.msra.mxu1 %v2909_v31 }
 0x248   :  { %977 = vmatpush.msra.mxu2 %v2848_v16  ;;  %997 = vmatpush.msrb.mxu3 %v2903_v30 }
 0x2bd   :  { %v646_v33 = vpop.f32.mrf.mxu1 }
 0x2be   :  { %v689_v8 = vadd.f32 %v646_v33, %v181_v4 }
 0x2c0   :  { %v2335_v10 = vmul.f32 -1.442695, %v689_v8 }
 0x2c2   :  { %2478 = vpow2.f32 %v2335_v10 }
 0x2c3   :  { %v666_v14 = vpop.f32.mrf.mxu2 }
 0x2c4   :  { %v709_v15 = vadd.f32 %v666_v14, %v222_v11  ;;  %v686_v45 = vpop.f32.mrf.mxu3 }
 0x2c5   :  { %v729_v25 = vadd.f32 %v2976_v59, %v686_v45 }
 0x2c6   :  { %v2336_v17 = vmul.f32 -1.442695, %v709_v15 }
 0x2c8   :  { %v2479_v6 = vpop.eup %2478  ;;  %2480 = vpow2.f32 %v2336_v17 }
 0x2c9   :  { %v693_v22 = vadd.f32 1.0, %v2479_v6 }
 0x2cb   :  { %2482 = vrcp.f32 %v693_v22  ;;  %v705_v37 = vand.u32 2147483648, %v693_v22  ;;  %v703_v42 = vand.u32 2147483647, %v693_v22  ;;  %vm699_vm11 = vweird.f32 %v693_v22 }
 0x2cd   :  { %v706_v48 = vor.u32 1.1754944e-38, %v705_v37  ;;  %vm704_vm13 = vcmp.eq.f32.partialorder %v703_v42, 8.507059e+37 }
 0x2ce   :  { %v2481_v24 = vpop.eup %2480 }
 0x2cf   :  { %v713_v28 = vadd.f32 1.0, %v2481_v24 }
 0x2d1   :  { %v2483_v35 = vpop.eup %2482  ;;  %2484 = vrcp.f32 %v713_v28  ;;  %v725_v55 = vand.u32 2147483648, %v713_v28  ;;  %v723_v4 = vand.u32 2147483647, %v713_v28  ;;  %vm719_vm15 = vweird.f32 %v713_v28 }
 0x2d2   :  { %v695_v38 = vmul.f32 %v2483_v35, %v693_v22  ;;  %vm700_vm10 = vweird.f32 %v2483_v35 }
 0x2d3   :  { %vm701_vm12 = vmor %vm699_vm11, %vm700_vm10  ;;  %v726_v10 = vor.u32 1.1754944e-38, %v725_v55  ;;  %vm724_vm2 = vcmp.eq.f32.partialorder %v723_v4, 8.507059e+37  ;;  %v266_v55 = vadd.f32 %v3079_v60, %v2982_v1  ;;  %v228_v60 = vadd.f32 %v3081_v61, %v2960_v43  ;;  %v1187_v61 = vld [vmem:[#allocation7 + $0x30] sm:$0xff] }
 0x2d4   :  { %v696_v40 = vsub.f32 1.0, %v695_v38 }
 0x2d6   :  { %v697_v41 = vmul.f32 %v2483_v35, %v696_v40 }
 0x2d7   :  { %v2485_v44 = vpop.eup %2484 }
 0x2d8   :  { %v715_v19 = vmul.f32 %v2485_v44, %v713_v28  ;;  %v698_v46 = vadd.f32 %v2483_v35, %v697_v41  ;;  %vm720_vm14 = vweird.f32 %v2485_v44 }
 0x2d9   :  { %vm721_vm1 = vmor %vm719_vm15, %vm720_vm14 }
 0x2da   :  { %v716_v5 = vsub.f32 1.0, %v715_v19  ;;  %v702_v12 = vsel %vm701_vm12, %v2483_v35, %v698_v46 }
 0x2db   :  { %v707_v52 = vsel %vm704_vm13, %v706_v48, %v702_v12 }
 0x2dc   :  { %v717_v53 = vmul.f32 %v2485_v44, %v716_v5  ;;  %v730_v57 = vmul.f32 %v729_v25, %v707_v52 }
 0x2de   :  { %v718_v33 = vadd.f32 %v2485_v44, %v717_v53  ;;  %v731_v8 = vadd.f32 %v730_v57, %v263_v50 }
 0x2e0   :  { %v722_v11 = vsel %vm721_vm1, %v2485_v44, %v718_v33  ;;  %2486 = vtanh.f32 %v731_v8 }
 0x2e1   :  { %v727_v14 = vsel %vm724_vm2, %v726_v10, %v722_v11 }
 0x2e2   :  { %v733_v15 = vsub.f32 1.0, %v727_v14  ;;  %v735_v18 = vmul.f32 %v727_v14, %v3057_v56 }
 0x2e6   :  { %v2487_v17 = vpop.eup %2486 }
 0x2e7   :  { %v734_v6 = vmul.f32 %v2487_v17, %v733_v15 }
 0x2e9   :  { %v3099_v22 = vadd.f32 %v735_v18, %v734_v6 }
 0x2eb   :  { %2337 = vmatmul.msk.f32.vlgmr.msra.gmra.mxu0 %vm129_vm0, %v3099_v22  ;;  %2338 = vmatmul.msk.f32.vlgmr.msrb.gmra.mxu1 %vm129_vm0, %v3099_v22 }
 0x2ec   :  { %2339 = vmatmul.msk.f32.vlgmr.msrb.gmra.mxu2 %vm129_vm0, %v3099_v22  ;;  %1014 = vmatpush.msra.mxu0 %v2867_v20 }
 0x2ed   :  { %1085 = vmatpush.msrb.mxu1 %v2816_v7  ;;  %1105 = vmatpush.msrb.mxu2 %v2869_v21  ;;  %v184_v7 = vadd.f32 %v2963_v47, %v2957_v39 }
 0x2ee   :  { %1015 = vmatpush.msra.mxu0 %v2891_v26 }
 0x2ef   :  { %1086 = vmatpush.msrb.mxu1 %v2823_v9  ;;  %1106 = vmatpush.msrb.mxu2 %v2878_v23  ;;  %v225_v9 = vadd.f32 %v3077_v58, %v2960_v43 }
 0x2f0   :  { %1016 = vmatpush.msra.mxu0 %v2901_v29 }
 0x2f1   :  { %1087 = vmatpush.msrb.mxu1 %v2839_v13  ;;  %1107 = vmatpush.msrb.mxu2 %v2893_v27 }
 0x2f2   :  { %1017 = vmatpush.msra.mxu0 %v2909_v31 }
 0x2f3   :  { %1088 = vmatpush.msrb.mxu1 %v2848_v16  ;;  %1108 = vmatpush.msrb.mxu2 %v2903_v30 }
 0x368   :  { %v757_v21 = vpop.f32.mrf.mxu0  ;;  %v777_v23 = vpop.f32.mrf.mxu1 }
 0x369   :  { %v800_v24 = vadd.f32 %v757_v21, %v184_v7  ;;  %v820_v28 = vadd.f32 %v777_v23, %v225_v9 }
 0x36b   :  { %v2340_v35 = vmul.f32 -1.442695, %v800_v24  ;;  %v2341_v13 = vmul.f32 -1.442695, %v820_v28  ;;  %v187_v24 = vadd.f32 %v2970_v54, %v2957_v39 }
 0x36d   :  { %2488 = vpow2.f32 %v2340_v35 }
 0x36e   :  { %2490 = vpow2.f32 %v2341_v13 }
 0x36f   :  { %v797_v48 = vpop.f32.mrf.mxu2 }
 0x370   :  { %v840_v50 = vadd.f32 %v2976_v59, %v797_v48 }
 0x373   :  { %v2489_v27 = vpop.eup %2488 }
 0x374   :  { %v2491_v38 = vpop.eup %2490  ;;  %v804_v40 = vadd.f32 1.0, %v2489_v27 }
 0x375   :  { %v824_v16 = vadd.f32 1.0, %v2491_v38  ;;  %v1190_v38 = vld [vmem:[#allocation7 + $0x48] sm:$0xff] }
 0x376   :  { %2492 = vrcp.f32 %v804_v40  ;;  %v816_v44 = vand.u32 2147483648, %v804_v40  ;;  %v814_v19 = vand.u32 2147483647, %v804_v40  ;;  %vm810_vm4 = vweird.f32 %v804_v40 }
 0x377   :  { %2494 = vrcp.f32 %v824_v16  ;;  %v836_v57 = vand.u32 2147483648, %v824_v16  ;;  %vm830_vm8 = vweird.f32 %v824_v16  ;;  %v834_v33 = vand.u32 2147483647, %v824_v16 }
 0x378   :  { %v817_v12 = vor.u32 1.1754944e-38, %v816_v44  ;;  %vm815_vm6 = vcmp.eq.f32.partialorder %v814_v19, 8.507059e+37 }
 0x379   :  { %v837_v11 = vor.u32 1.1754944e-38, %v836_v57  ;;  %vm835_vm10 = vcmp.eq.f32.partialorder %v834_v33, 8.507059e+37 }
 0x37c   :  { %v2493_v30 = vpop.eup %2492 }
 0x37d   :  { %v2495_v37 = vpop.eup %2494  ;;  %v806_v47 = vmul.f32 %v2493_v30, %v804_v40  ;;  %vm811_vm3 = vweird.f32 %v2493_v30  ;;  %v1184_v40 = vld [vmem:[#allocation7 + $0x18] sm:$0xff] }
 0x37e   :  { %v826_v41 = vmul.f32 %v2495_v37, %v824_v16  ;;  %vm812_vm5 = vmor %vm810_vm4, %vm811_vm3  ;;  %vm831_vm7 = vweird.f32 %v2495_v37 }
 0x37f   :  { %v807_v42 = vsub.f32 1.0, %v806_v47  ;;  %vm832_vm9 = vmor %vm830_vm8, %vm831_vm7 }
 0x380   :  { %v827_v58 = vsub.f32 1.0, %v826_v41 }
 0x381   :  { %v808_v45 = vmul.f32 %v2493_v30, %v807_v42 }
 0x382   :  { %v828_v46 = vmul.f32 %v2495_v37, %v827_v58 }
 0x383   :  { %v809_v5 = vadd.f32 %v2493_v30, %v808_v45 }
 0x384   :  { %v829_v52 = vadd.f32 %v2495_v37, %v828_v46 }
 0x385   :  { %v813_v25 = vsel %vm812_vm5, %v2493_v30, %v809_v5  ;;  %v1181_v30 = vld [vmem:[#allocation7] sm:$0xff] }
 0x386   :  { %v818_v53 = vsel %vm815_vm6, %v817_v12, %v813_v25  ;;  %v833_v10 = vsel %vm832_vm9, %v2495_v37, %v829_v52  ;;  %v269_v52 = vadd.f32 %v3083_v62, %v2982_v1  ;;  %v190_v62 = vadd.f32 %v2951_v34, %v2957_v39  ;;  %v1191_v34 = vld [vmem:[#allocation7 + $0x50] sm:$0xff] }
 0x387   :  { %v841_v4 = vmul.f32 %v840_v50, %v818_v53  ;;  %v838_v14 = vsel %vm835_vm10, %v837_v11, %v833_v10 }
 0x388   :  { %v844_v15 = vsub.f32 1.0, %v838_v14  ;;  %v846_v18 = vmul.f32 %v838_v14, %v3099_v22 }
 0x389   :  { %v842_v8 = vadd.f32 %v841_v4, %v266_v55 }
 0x38b   :  { %2496 = vtanh.f32 %v842_v8 }
 0x391   :  { %v2497_v17 = vpop.eup %2496 }
 0x392   :  { %v845_v6 = vmul.f32 %v2497_v17, %v844_v15 }
 0x394   :  { %v3127_v7 = vadd.f32 %v846_v18, %v845_v6  ;;  %v231_v18 = vadd.f32 %v3085_v63, %v2960_v43  ;;  %v3174_v63 = vld [vmem:[#allocation8 + $0x30] sm:$0xff] }
 0x396   :  { %2342 = vmatmul.msk.f32.vlgmr.msra.gmra.mxu3 %vm129_vm0, %v3127_v7  ;;  %2343 = vmatmul.msk.f32.vlgmr.msrb.gmra.mxu0 %vm129_vm0, %v3127_v7 }
 0x397   :  { %2344 = vmatmul.msk.f32.vlgmr.msra.gmra.mxu1 %vm129_vm0, %v3127_v7  ;;  %1125 = vmatpush.msra.mxu3 %v2867_v20 }
 0x398   :  { %1216 = vmatpush.msrb.mxu0 %v1190_v38  ;;  %1257 = vmatpush.msra.mxu1 %v1191_v34  ;;  %v1189_v38 = vld [vmem:[#allocation7 + $0x40] sm:$0xff] }
 0x399   :  { %1126 = vmatpush.msra.mxu3 %v2891_v26 }
 0x39a   :  { %1217 = vmatpush.msrb.mxu0 %v1187_v61  ;;  %v3176_v61 = vld [vmem:[#allocation8 + $0x18] sm:$0xff] }
 0x39b   :  { %1127 = vmatpush.msra.mxu3 %v2901_v29 }
 0x39c   :  { %1218 = vmatpush.msrb.mxu0 %v1184_v40  ;;  %v1185_v40 = vld [vmem:[#allocation7 + $0x20] sm:$0xff] }
 0x39d   :  { %1128 = vmatpush.msra.mxu3 %v2909_v31 }
 0x39e   :  { %1219 = vmatpush.msrb.mxu0 %v1181_v30  ;;  %v3179_v30 = vld [vmem:[#allocation8] sm:$0xff] }
 0x413   :  { %v888_v9 = vpop.f32.mrf.mxu0 }
 0x414   :  { %v931_v21 = vadd.f32 %v888_v9, %v228_v60  ;;  %v908_v19 = vpop.f32.mrf.mxu1 }
 0x415   :  { %v951_v5 = vadd.f32 %v2976_v59, %v908_v19 }
 0x416   :  { %v2346_v23 = vmul.f32 -1.442695, %v931_v21 }
 0x418   :  { %2498 = vpow2.f32 %v2346_v23 }
 0x419   :  { %v868_v28 = vpop.f32.mrf.mxu3 }
 0x41a   :  { %v911_v35 = vadd.f32 %v868_v28, %v187_v24 }
 0x41c   :  { %v2345_v13 = vmul.f32 -1.442695, %v911_v35 }
 0x41e   :  { %v2499_v20 = vpop.eup %2498  ;;  %2500 = vpow2.f32 %v2345_v13 }
 0x41f   :  { %v935_v26 = vadd.f32 1.0, %v2499_v20 }
 0x421   :  { %2502 = vrcp.f32 %v935_v26  ;;  %v947_v53 = vand.u32 2147483648, %v935_v26  ;;  %vm941_vm1 = vweird.f32 %v935_v26  ;;  %v945_v57 = vand.u32 2147483647, %v935_v26 }
 0x423   :  { %v948_v8 = vor.u32 1.1754944e-38, %v947_v53  ;;  %vm946_vm3 = vcmp.eq.f32.partialorder %v945_v57, 8.507059e+37 }
 0x424   :  { %v2501_v29 = vpop.eup %2500 }
 0x425   :  { %v915_v27 = vadd.f32 1.0, %v2501_v29  ;;  %v3171_v29 = vld [vmem:[#allocation8 + $0x48] sm:$0xff] }
 0x427   :  { %2504 = vrcp.f32 %v915_v27  ;;  %v2503_v31 = vpop.eup %2502  ;;  %v927_v42 = vand.u32 2147483648, %v915_v27  ;;  %v925_v44 = vand.u32 2147483647, %v915_v27  ;;  %vm921_vm12 = vweird.f32 %v915_v27 }
 0x428   :  { %v937_v16 = vmul.f32 %v2503_v31, %v935_v26  ;;  %vm942_vm15 = vweird.f32 %v2503_v31 }
 0x429   :  { %v928_v48 = vor.u32 1.1754944e-38, %v927_v42  ;;  %vm926_vm14 = vcmp.eq.f32.partialorder %v925_v44, 8.507059e+37  ;;  %vm943_vm2 = vmor %vm941_vm1, %vm942_vm15 }
 0x42a   :  { %v938_v47 = vsub.f32 1.0, %v937_v16  ;;  %v1186_v16 = vld [vmem:[#allocation7 + $0x28] sm:$0xff] }
 0x42c   :  { %v939_v45 = vmul.f32 %v2503_v31, %v938_v47  ;;  %v1183_v47 = vld [vmem:[#allocation7 + $0x10] sm:$0xff] }
 0x42d   :  { %v2505_v54 = vpop.eup %2504 }
 0x42e   :  { %v917_v37 = vmul.f32 %v2505_v54, %v915_v27  ;;  %vm922_vm11 = vweird.f32 %v2505_v54  ;;  %v940_v25 = vadd.f32 %v2503_v31, %v939_v45  ;;  %v1192_v27 = vld [vmem:[#allocation7 + $0x58] sm:$0xff] }
 0x42f   :  { %vm923_vm13 = vmor %vm921_vm12, %vm922_vm11 }
 0x430   :  { %v918_v41 = vsub.f32 1.0, %v917_v37  ;;  %v944_v33 = vsel %vm943_vm2, %v2503_v31, %v940_v25  ;;  %v1188_v31 = vld [vmem:[#allocation7 + $0x38] sm:$0xff] }
 0x431   :  { %v949_v10 = vsel %vm946_vm3, %v948_v8, %v944_v33  ;;  %1258 = vmatpush.msra.mxu1 %v1188_v31 }
 0x432   :  { %v919_v58 = vmul.f32 %v2505_v54, %v918_v41  ;;  %v955_v11 = vsub.f32 1.0, %v949_v10  ;;  %v957_v15 = vmul.f32 %v949_v10, %v3127_v7 }
 0x433   :  { %1259 = vmatpush.msra.mxu1 %v1185_v40 }
 0x434   :  { %v920_v46 = vadd.f32 %v2505_v54, %v919_v58 }
 0x436   :  { %v924_v12 = vsel %vm923_vm13, %v2505_v54, %v920_v46  ;;  %v1182_v54 = vld [vmem:[#allocation7 + $0x8] sm:$0xff] }
 0x437   :  { %v929_v50 = vsel %vm926_vm14, %v928_v48, %v924_v12  ;;  %1260 = vmatpush.msra.mxu1 %v1182_v54 }
 0x438   :  { %v952_v55 = vmul.f32 %v951_v5, %v929_v50 }
 0x43a   :  { %v953_v4 = vadd.f32 %v952_v55, %v269_v52 }
 0x43c   :  { %2506 = vtanh.f32 %v953_v4  ;;  %v272_v4 = vadd.f32 %v3087_v0, %v2982_v1 }
 0x442   :  { %v2507_v14 = vpop.eup %2506 }
 0x443   :  { %v956_v17 = vmul.f32 %v2507_v14, %v955_v11 }
 0x445   :  { %v3147_v6 = vadd.f32 %v957_v15, %v956_v17 }
 0x447   :  { %2347 = vmatmul.msk.f32.vlgmr.msra.gmra.mxu2 %vm129_vm0, %v3147_v6  ;;  %2348 = vmatmul.msk.f32.vlgmr.msrb.gmra.mxu3 %vm129_vm0, %v3147_v6 }
 0x448   :  { %2349 = vmatmul.msk.f32.vlgmr.msra.gmra.mxu0 %vm129_vm0, %v3147_v6  ;;  %1355 = vmatpush.msrb.mxu3 %v3171_v29 }
 0x449   :  { %1298 = vmatpush.msra.mxu2 %v1192_v27 }
 0x44a   :  { %1356 = vmatpush.msrb.mxu3 %v3174_v63 }
 0x44b   :  { %1299 = vmatpush.msra.mxu2 %v1189_v38 }
 0x44c   :  { %1357 = vmatpush.msrb.mxu3 %v3176_v61 }
 0x44d   :  { %1300 = vmatpush.msra.mxu2 %v1186_v16 }
 0x44e   :  { %1358 = vmatpush.msrb.mxu3 %v3179_v30 }
 0x44f   :  { %1301 = vmatpush.msra.mxu2 %v1183_v47 }
 0x450   :  { %2357 = vmatmul.msk.f32.vlgmr.msrb.gmra.mxu0 %vm129_vm0, %v2994_v49 }
 0x458   :  { %2358 = vmatmul.msk.f32.gmra.mxu0 %vm129_vm0, %v3031_v51 }
 0x460   :  { %2359 = vmatmul.msk.f32.gmra.mxu0 %vm129_vm0, %v3057_v56 }
 0x468   :  { %2360 = vmatmul.msk.f32.gmra.mxu0 %vm129_vm0, %v3099_v22 }
 0x470   :  { %2361 = vmatmul.msk.f32.gmra.mxu0 %vm129_vm0, %v3127_v7 }
 0x478   :  { %2362 = vmatmul.msk.f32.gmra.mxu0 %vm129_vm0, %v3147_v6 }
 0x4c5   :  { %v1019_v5 = vpop.f32.mrf.mxu0 }
 0x4c6   :  { %v1062_v52 = vadd.f32 %v2976_v59, %v1019_v5  ;;  %v3186_v59 = vld [vmem:[#allocation8 + $0x58] sm:$0xff] }
 0x4c7   :  { %1617 = vmatpush.msra.mxu0 %v3186_v59 }
 0x4ca   :  { %v979_v60 = vpop.f32.mrf.mxu2  ;;  %v999_v9 = vpop.f32.mrf.mxu3 }
 0x4cb   :  { %v1022_v21 = vadd.f32 %v979_v60, %v190_v62  ;;  %v1042_v23 = vadd.f32 %v999_v9, %v231_v18  ;;  %v3189_v18 = vld [vmem:[#allocation8 + $0x40] sm:$0xff] }
 0x4cc   :  { %1618 = vmatpush.msra.mxu0 %v3189_v18 }
 0x4cd   :  { %v2350_v24 = vmul.f32 -1.442695, %v1022_v21  ;;  %v2351_v28 = vmul.f32 -1.442695, %v1042_v23  ;;  %v3195_v23 = vld [vmem:[#allocation8 + $0x50] sm:$0xff] }
 0x4cf   :  { %2508 = vpow2.f32 %v2350_v24  ;;  %v3205_v24 = vld [vmem:[#allocation8 + $0x38] sm:$0xff] }
 0x4d0   :  { %2510 = vpow2.f32 %v2351_v28  ;;  %v3207_v28 = vld [vmem:[#allocation8 + $0x28] sm:$0xff] }
 0x4d1   :  { %1619 = vmatpush.msra.mxu0 %v3207_v28 }
 0x4d5   :  { %v2509_v35 = vpop.eup %2508 }
 0x4d6   :  { %v2511_v13 = vpop.eup %2510  ;;  %v1026_v20 = vadd.f32 1.0, %v2509_v35  ;;  %v3211_v35 = vld [vmem:[#allocation8 + $0x20] sm:$0xff] }
 0x4d7   :  { %v1046_v26 = vadd.f32 1.0, %v2511_v13  ;;  %v3213_v13 = vld [vmem:[#allocation8 + $0x10] sm:$0xff] }
 0x4d8   :  { %2512 = vrcp.f32 %v1026_v20  ;;  %v1038_v45 = vand.u32 2147483648, %v1026_v20  ;;  %v1036_v48 = vand.u32 2147483647, %v1026_v20  ;;  %vm1032_vm5 = vweird.f32 %v1026_v20  ;;  %1620 = vmatpush.msra.mxu0 %v3213_v13 }
 0x4d9   :  { %2514 = vrcp.f32 %v1046_v26  ;;  %v1058_v8 = vand.u32 2147483648, %v1046_v26  ;;  %vm1052_vm9 = vweird.f32 %v1046_v26  ;;  %v1056_v10 = vand.u32 2147483647, %v1046_v26 }
 0x4da   :  { %v1039_v50 = vor.u32 1.1754944e-38, %v1038_v45  ;;  %vm1037_vm7 = vcmp.eq.f32.partialorder %v1036_v48, 8.507059e+37  ;;  %1799 = vmatpush.msrb.mxu0 %v3171_v29 }
 0x4db   :  { %v1059_v15 = vor.u32 1.1754944e-38, %v1058_v8  ;;  %vm1057_vm11 = vcmp.eq.f32.partialorder %v1056_v10, 8.507059e+37  ;;  %v2608_v10 = vld [vmem:[%s3577_s4] ss:$0 sm:$0xff] }
 0x4dc   :  { %1800 = vmatpush.msrb.mxu0 %v3174_v63 }
 0x4de   :  { %v2513_v37 = vpop.eup %2512  ;;  %1801 = vmatpush.msrb.mxu0 %v3176_v61 }
 0x4df   :  { %v2515_v41 = vpop.eup %2514  ;;  %v1028_v42 = vmul.f32 %v2513_v37, %v1026_v20  ;;  %vm1033_vm4 = vweird.f32 %v2513_v37  ;;  %v3223_v20 = vld [vmem:[#allocation8 + $0x8] sm:$0xff] }
 0x4e0   :  { %v1048_v58 = vmul.f32 %v2515_v41, %v1046_v26  ;;  %vm1034_vm6 = vmor %vm1032_vm5, %vm1033_vm4  ;;  %vm1053_vm8 = vweird.f32 %v2515_v41  ;;  %1802 = vmatpush.msrb.mxu0 %v3179_v30 }
 0x4e1   :  { %v1029_v44 = vsub.f32 1.0, %v1028_v42  ;;  %vm1054_vm10 = vmor %vm1052_vm9, %vm1053_vm8 }
 0x4e2   :  { %v1049_v19 = vsub.f32 1.0, %v1048_v58 }
 0x4e3   :  { %v1030_v46 = vmul.f32 %v2513_v37, %v1029_v44 }
 0x4e4   :  { %v1050_v12 = vmul.f32 %v2515_v41, %v1049_v19 }
 0x4e5   :  { %v1031_v25 = vadd.f32 %v2513_v37, %v1030_v46 }
 0x4e6   :  { %v1051_v57 = vadd.f32 %v2515_v41, %v1050_v12 }
 0x4e7   :  { %v1035_v53 = vsel %vm1034_vm6, %v2513_v37, %v1031_v25 }
 0x4e8   :  { %v1040_v55 = vsel %vm1037_vm7, %v1039_v50, %v1035_v53  ;;  %v1055_v14 = vsel %vm1054_vm10, %v2515_v41, %v1051_v57 }
 0x4e9   :  { %v1063_v33 = vmul.f32 %v1062_v52, %v1040_v55  ;;  %v1060_v17 = vsel %vm1057_vm11, %v1059_v15, %v1055_v14  ;;  %v275_v14 = vadd.f32 %v3091_v3, %v2982_v1 }
 0x4ea   :  { %v1066_v62 = vsub.f32 1.0, %v1060_v17  ;;  %v1068_v9 = vmul.f32 %v1060_v17, %v3147_v6 }
 0x4eb   :  { %v1064_v11 = vadd.f32 %v1063_v33, %v272_v4 }
 0x4ed   :  { %2516 = vtanh.f32 %v1064_v11 }
 0x4f3   :  { %v2517_v60 = vpop.eup %2516 }
 0x4f4   :  { %v1067_v0 = vmul.f32 %v2517_v60, %v1066_v62 }
 0x4f6   :  { %v3193_v21 = vadd.f32 %v1068_v9, %v1067_v0 }
 0x4f8   :  { %2352 = vmatmul.msk.f32.vlgmr.msrb.gmra.mxu1 %vm129_vm0, %v3193_v21  ;;  %2353 = vmatmul.msk.f32.vlgmr.msrb.gmra.mxu2 %vm129_vm0, %v3193_v21 }
 0x4f9   :  { %2354 = vmatmul.msk.f32.vlgmr.msra.gmra.mxu3 %vm129_vm0, %v3193_v21  ;;  %2363 = vmatmul.msk.f32.gmra.mxu0 %vm129_vm0, %v3193_v21 }
 0x4fa   :  { %1375 = vmatpush.msra.mxu3 %v3195_v23  ;;  %1688 = vmatpush.msrb.mxu1 %v3171_v29 }
 0x4fb   :  { %1708 = vmatpush.msrb.mxu2 %v3195_v23 }
 0x4fc   :  { %1376 = vmatpush.msra.mxu3 %v3205_v24  ;;  %1689 = vmatpush.msrb.mxu1 %v3174_v63 }
 0x4fd   :  { %1709 = vmatpush.msrb.mxu2 %v3205_v24 }
 0x4fe   :  { %1377 = vmatpush.msra.mxu3 %v3211_v35  ;;  %1690 = vmatpush.msrb.mxu1 %v3176_v61 }
 0x4ff   :  { %1710 = vmatpush.msrb.mxu2 %v3211_v35 }
 0x500   :  { %2365 = vmatmul.msk.f32.vlgmr.msra.gmra.mxu1 %vm129_vm0, %v2994_v49  ;;  %2373 = vmatmul.msk.f32.vlgmr.msra.gmra.mxu2 %vm129_vm0, %v2994_v49 }
 0x501   :  { %1359 = vmatmul.f32.vlgmr.msrb.gmra.mxu3 %v2718_v32  ;;  %1691 = vmatpush.msrb.mxu1 %v3179_v30 }
 0x502   :  { %1378 = vmatpush.msra.mxu3 %v3223_v20  ;;  %1711 = vmatpush.msrb.mxu2 %v3223_v20 }
 0x503   :  { %1819 = vmatpush.msra.mxu1 %v3195_v23 }
 0x504   :  { %1395 = vmatpush.msrb.mxu3 %v3186_v59  ;;  %1839 = vmatpush.msra.mxu2 %v3186_v59 }
 0x505   :  { %1820 = vmatpush.msra.mxu1 %v3205_v24 }
 0x506   :  { %1396 = vmatpush.msrb.mxu3 %v3189_v18  ;;  %1840 = vmatpush.msra.mxu2 %v3189_v18 }
 0x507   :  { %1821 = vmatpush.msra.mxu1 %v3211_v35 }
 0x508   :  { %1397 = vmatpush.msrb.mxu3 %v3207_v28  ;;  %2366 = vmatmul.msk.f32.gmra.mxu1 %vm129_vm0, %v3031_v51 }
 0x509   :  { %2374 = vmatmul.msk.f32.gmra.mxu2 %vm129_vm0, %v3031_v51  ;;  %1379 = vmatmul.f32.vlgmr.msra.gmra.mxu3 %v2718_v32 }
 0x50a   :  { %1841 = vmatpush.msra.mxu2 %v3207_v28  ;;  %1398 = vmatpush.msrb.mxu3 %v3213_v13 }
 0x50b   :  { %1822 = vmatpush.msra.mxu1 %v3223_v20 }
 0x50c   :  { %1466 = vmatpush.msra.mxu3 %v3171_v29  ;;  %1842 = vmatpush.msra.mxu2 %v3213_v13 }
 0x50e   :  { %1467 = vmatpush.msra.mxu3 %v3174_v63 }
 0x510   :  { %1468 = vmatpush.msra.mxu3 %v3176_v61  ;;  %2367 = vmatmul.msk.f32.gmra.mxu1 %vm129_vm0, %v3057_v56 }
 0x511   :  { %2375 = vmatmul.msk.f32.gmra.mxu2 %vm129_vm0, %v3057_v56  ;;  %1399 = vmatmul.f32.vlgmr.msrb.gmra.mxu3 %v2718_v32  ;;  %v193_v32 = vadd.f32 %v2953_v36, %v2957_v39  ;;  %v1221_v39 = vpop.f32.mrf.mxu0 }
 0x512   :  { %1469 = vmatpush.msra.mxu3 %v3179_v30 }
 0x514   :  { %1486 = vmatpush.msrb.mxu3 %v3195_v23 }
 0x516   :  { %1487 = vmatpush.msrb.mxu3 %v3205_v24 }
 0x518   :  { %1488 = vmatpush.msrb.mxu3 %v3211_v35  ;;  %2368 = vmatmul.msk.f32.gmra.mxu1 %vm129_vm0, %v3099_v22 }
 0x519   :  { %2376 = vmatmul.msk.f32.gmra.mxu2 %vm129_vm0, %v3099_v22  ;;  %v234_v22 = vadd.f32 %v3089_v2, %v2960_v43 }
 0x51a   :  { %1489 = vmatpush.msrb.mxu3 %v3223_v20 }
 0x520   :  { %2369 = vmatmul.msk.f32.gmra.mxu1 %vm129_vm0, %v3127_v7 }
 0x521   :  { %2377 = vmatmul.msk.f32.gmra.mxu2 %vm129_vm0, %v3127_v7 }
 0x528   :  { %2370 = vmatmul.msk.f32.gmra.mxu1 %vm129_vm0, %v3147_v6 }
 0x529   :  { %2378 = vmatmul.msk.f32.gmra.mxu2 %vm129_vm0, %v3147_v6  ;;  %v3291_v6 = vld [vmem:[%s3580_s7] sm:$0x7] }
 0x52a   :  { %v3294_v31 = vperm.slane %v3291_v6, 0  ;;  %v3298_v37 = vperm.slane %v3291_v6, 1 }
 0x52c   :  { %v1222_v40 = vadd.f32 %v1221_v39, %v3294_v31 }
 0x530   :  { %2371 = vmatmul.msk.f32.gmra.mxu1 %vm129_vm0, %v3193_v21 }
 0x531   :  { %2379 = vmatmul.msk.f32.gmra.mxu2 %vm129_vm0, %v3193_v21 }
 0x575   :  { %v1090_v49 = vpop.f32.mrf.mxu1 }
 0x576   :  { %v1133_v51 = vadd.f32 %v1090_v49, %v193_v32 }
 0x578   :  { %v2355_v56 = vmul.f32 -1.442695, %v1133_v51 }
 0x57a   :  { %2518 = vpow2.f32 %v2355_v56 }
 0x57b   :  { %v1110_v7 = vpop.f32.mrf.mxu2 }
 0x57c   :  { %v1153_v26 = vadd.f32 %v1110_v7, %v234_v22  ;;  %v1130_v34 = vpop.f32.mrf.mxu3 }
 0x57d   :  { %v1262_v41 = vpop.f32.mrf.mxu1  ;;  %v1173_v11 = vadd.f32 %v2608_v10, %v1130_v34 }
 0x57e   :  { %v2356_v27 = vmul.f32 -1.442695, %v1153_v26  ;;  %v1263_v44 = vadd.f32 %v1262_v41, %v3298_v37  ;;  %v3309_v26 = vld [vmem:[%s3581_s8] ss:$0 sm:$0xff] }
 0x580   :  { %v2519_v36 = vpop.eup %2518  ;;  %2520 = vpow2.f32 %v2356_v27 }
 0x581   :  { %v1137_v38 = vadd.f32 1.0, %v2519_v36 }
 0x583   :  { %2522 = vrcp.f32 %v1137_v38  ;;  %v1149_v46 = vand.u32 2147483648, %v1137_v38  ;;  %v1147_v12 = vand.u32 2147483647, %v1137_v38  ;;  %vm1143_vm13 = vweird.f32 %v1137_v38  ;;  %v1303_v41 = vpop.f32.mrf.mxu2 }
 0x584   :  { %v1360_v43 = vpop.f32.mrf.mxu3 }
 0x585   :  { %v1403_v2 = vadd.f32 %v1360_v43, %v1222_v40  ;;  %v1150_v57 = vor.u32 1.1754944e-38, %v1149_v46  ;;  %vm1148_vm15 = vcmp.eq.f32.partialorder %v1147_v12, 8.507059e+37 }
 0x586   :  { %v2521_v16 = vpop.eup %2520 }
 0x587   :  { %v1157_v54 = vadd.f32 1.0, %v2521_v16  ;;  %v2381_v47 = vmul.f32 -1.442695, %v1403_v2 }
 0x589   :  { %v2523_v42 = vpop.eup %2522  ;;  %2524 = vrcp.f32 %v1157_v54  ;;  %v1169_v60 = vand.u32 2147483648, %v1157_v54  ;;  %v1167_v0 = vand.u32 2147483647, %v1157_v54  ;;  %vm1163_vm2 = vweird.f32 %v1157_v54 }
 0x58a   :  { %v1139_v58 = vmul.f32 %v2523_v42, %v1137_v38  ;;  %2526 = vpow2.f32 %v2381_v47  ;;  %vm1144_vm12 = vweird.f32 %v2523_v42  ;;  %v3313_v47 = vperm.slane %v3291_v6, 2 }
 0x58b   :  { %vm1145_vm14 = vmor %vm1143_vm13, %vm1144_vm12  ;;  %v1170_v22 = vor.u32 1.1754944e-38, %v1169_v60  ;;  %vm1168_vm4 = vcmp.eq.f32.partialorder %v1167_v0, 8.507059e+37 }
 0x58c   :  { %v1140_v45 = vsub.f32 1.0, %v1139_v58  ;;  %v1380_v19 = vpop.f32.mrf.mxu3 }
 0x58d   :  { %v1423_v48 = vadd.f32 %v1380_v19, %v1263_v44 }
 0x58e   :  { %v1141_v5 = vmul.f32 %v2523_v42, %v1140_v45 }
 0x58f   :  { %v2525_v25 = vpop.eup %2524  ;;  %v2382_v50 = vmul.f32 -1.442695, %v1423_v48 }
 0x590   :  { %v2527_v52 = vpop.eup %2526  ;;  %v1159_v53 = vmul.f32 %v2525_v25, %v1157_v54  ;;  %v1142_v55 = vadd.f32 %v2523_v42, %v1141_v5  ;;  %vm1164_vm1 = vweird.f32 %v2525_v25 }
 0x591   :  { %v1407_v4 = vadd.f32 1.0, %v2527_v52  ;;  %2528 = vpow2.f32 %v2382_v50  ;;  %vm1165_vm3 = vmor %vm1163_vm2, %vm1164_vm1 }
 0x592   :  { %v1160_v33 = vsub.f32 1.0, %v1159_v53  ;;  %v1146_v8 = vsel %vm1145_vm14, %v2523_v42, %v1142_v55 }
 0x593   :  { %v1151_v15 = vsel %vm1148_vm15, %v1150_v57, %v1146_v8  ;;  %2530 = vrcp.f32 %v1407_v4  ;;  %v1417_v38 = vand.u32 2147483647, %v1407_v4  ;;  %v1419_v40 = vand.u32 2147483648, %v1407_v4 }
 0x594   :  { %v1174_v17 = vmul.f32 %v1173_v11, %v1151_v15  ;;  %v1161_v62 = vmul.f32 %v2525_v25, %v1160_v33  ;;  %v1400_v39 = vpop.f32.mrf.mxu3  ;;  %vm1413_vm6 = vweird.f32 %v1407_v4  ;;  %v1224_v15 = vpop.f32.mrf.mxu0 }
 0x595   :  { %v1443_v44 = vadd.f32 %v3309_v26, %v1400_v39  ;;  %v1420_v19 = vor.u32 1.1754944e-38, %v1419_v40  ;;  %vm1418_vm8 = vcmp.eq.f32.partialorder %v1417_v38, 8.507059e+37 }
 0x596   :  { %v1175_v9 = vadd.f32 %v1174_v17, %v275_v14  ;;  %v1162_v32 = vadd.f32 %v2525_v25, %v1161_v62  ;;  %v1225_v17 = vadd.f32 %v1224_v15, %v3294_v31 }
 0x597   :  { %v2529_v49 = vpop.eup %2528 }
 0x598   :  { %2532 = vtanh.f32 %v1175_v9  ;;  %v1427_v51 = vadd.f32 1.0, %v2529_v49  ;;  %v1166_v56 = vsel %vm1165_vm3, %v2525_v25, %v1162_v32  ;;  %v1265_v9 = vpop.f32.mrf.mxu1 }
 0x599   :  { %v2531_v7 = vpop.eup %2530  ;;  %v1171_v1 = vsel %vm1168_vm4, %v1170_v22, %v1166_v56  ;;  %v1266_v32 = vadd.f32 %v1265_v9, %v3298_v37 }
 0x59a   :  { %2534 = vrcp.f32 %v1427_v51  ;;  %v1409_v3 = vmul.f32 %v2531_v7, %v1407_v4  ;;  %v1177_v27 = vsub.f32 1.0, %v1171_v1  ;;  %vm1414_vm5 = vweird.f32 %v2531_v7 }
 0x59b   :  { %v1179_v16 = vmul.f32 %v1171_v1, %v3193_v21  ;;  %vm1415_vm7 = vmor %vm1413_vm6, %vm1414_vm5  ;;  %v1304_v21 = vadd.f32 %v1303_v41, %v3313_v47  ;;  %v1439_v6 = vand.u32 2147483648, %v1427_v51  ;;  %v1437_v25 = vand.u32 2147483647, %v1427_v51 }
 0x59c   :  { %v1410_v34 = vsub.f32 1.0, %v1409_v3  ;;  %vm1433_vm10 = vweird.f32 %v1427_v51 }
 0x59d   :  { %v1440_v55 = vor.u32 1.1754944e-38, %v1439_v6  ;;  %vm1438_vm12 = vcmp.eq.f32.partialorder %v1437_v25, 8.507059e+37 }
 0x59e   :  { %v2533_v36 = vpop.eup %2532  ;;  %v1411_v43 = vmul.f32 %v2531_v7, %v1410_v34 }
 0x59f   :  { %v1178_v2 = vmul.f32 %v2533_v36, %v1177_v27 }
 0x5a0   :  { %v2535_v54 = vpop.eup %2534  ;;  %v1412_v58 = vadd.f32 %v2531_v7, %v1411_v43 }
 0x5a1   :  { %v1429_v42 = vmul.f32 %v2535_v54, %v1427_v51  ;;  %v1180_v45 = vadd.f32 %v1179_v16, %v1178_v2  ;;  %vm1434_vm9 = vweird.f32 %v2535_v54 }
 0x5a2   :  { %v1416_v48 = vsel %vm1415_vm7, %v2531_v7, %v1412_v58  ;;  %vm1435_vm11 = vmor %vm1433_vm10, %vm1434_vm9 }
 0x5a3   :  { %v1430_v46 = vsub.f32 1.0, %v1429_v42  ;;  %2364 = vmatmul.msk.f32.gmra.mxu0 %vm129_vm0, %v1180_v45  ;;  %2372 = vmatmul.msk.f32.gmra.mxu1 %vm129_vm0, %v1180_v45  ;;  %v1421_v5 = vsel %vm1418_vm8, %v1420_v19, %v1416_v48 }
 0x5a4   :  { %2380 = vmatmul.msk.f32.gmra.mxu2 %vm129_vm0, %v1180_v45  ;;  %v1444_v50 = vmul.f32 %v1443_v44, %v1421_v5 }
 0x5a5   :  { %v1431_v12 = vmul.f32 %v2535_v54, %v1430_v46 }
 0x5a6   :  { %v1445_v53 = vadd.f32 %v1444_v50, %v1304_v21 }
 0x5a7   :  { %v1432_v52 = vadd.f32 %v2535_v54, %v1431_v12 }
 0x5a8   :  { %2536 = vtanh.f32 %v1445_v53 }
 0x5a9   :  { %v1436_v57 = vsel %vm1435_vm11, %v2535_v54, %v1432_v52  ;;  %v1306_v54 = vpop.f32.mrf.mxu2 }
 0x5aa   :  { %v1441_v4 = vsel %vm1438_vm12, %v1440_v55, %v1436_v57  ;;  %v1307_v19 = vadd.f32 %v1306_v54, %v3313_v47 }
 0x5ab   :  { %v1447_v33 = vsub.f32 1.0, %v1441_v4  ;;  %v1449_v11 = vmul.f32 0.0, %v1441_v4 }
 0x5ae   :  { %v2537_v8 = vpop.eup %2536 }
 0x5af   :  { %v1448_v10 = vmul.f32 %v2537_v8, %v1447_v33 }
 0x5b1   :  { %v3320_v14 = vadd.f32 %v1449_v11, %v1448_v10  ;;  %v1227_v10 = vpop.f32.mrf.mxu0 }
 0x5b3   :  { %2383 = vmatmul.msk.f32.vlgmr.msra.gmra.mxu3 %vm129_vm0, %v3320_v14 }
 0x5b4   :  { %1506 = vmatpush.msra.mxu3 %v3186_v59 }
 0x5b6   :  { %1507 = vmatpush.msra.mxu3 %v3189_v18 }
 0x5b8   :  { %1508 = vmatpush.msra.mxu3 %v3207_v28 }
 0x5b9   :  { %v3365_v11 = vpop.f32.mrf.mxu0 }
 0x5ba   :  { %1509 = vmatpush.msra.mxu3 %v3213_v13 }
 0x5bb   :  { %2384 = vmatmul.msk.f32.vlgmr.msrb.gmra.mxu3 %vm129_vm0, %v3320_v14 }
 0x5bc   :  { %1577 = vmatpush.msrb.mxu3 %v3171_v29 }
 0x5be   :  { %1578 = vmatpush.msrb.mxu3 %v3174_v63 }
 0x5c0   :  { %1579 = vmatpush.msrb.mxu3 %v3176_v61 }
 0x5c1   :  { %v3367_v15 = vpop.f32.mrf.mxu0 }
 0x5c2   :  { %1580 = vmatpush.msrb.mxu3 %v3179_v30 }
 0x5c3   :  { %2385 = vmatmul.msk.f32.vlgmr.msra.gmra.mxu3 %vm129_vm0, %v3320_v14 }
 0x5c4   :  { %1597 = vmatpush.msra.mxu3 %v3195_v23 }
 0x5c6   :  { %1598 = vmatpush.msra.mxu3 %v3205_v24 }
 0x5c8   :  { %1599 = vmatpush.msra.mxu3 %v3211_v35 }
 0x5ca   :  { %1600 = vmatpush.msra.mxu3 %v3223_v20 }
 0x636   :  { %v1471_v62 = vpop.f32.mrf.mxu3 }
 0x637   :  { %v1514_v60 = vadd.f32 %v1471_v62, %v1225_v17  ;;  %v1228_v17 = vadd.f32 %v1227_v10, %v3294_v31 }
 0x639   :  { %v2386_v0 = vmul.f32 -1.442695, %v1514_v60 }
 0x63b   :  { %2538 = vpow2.f32 %v2386_v0  ;;  %v3370_v0 = vpop.f32.mrf.mxu0 }
 0x63e   :  { %v1491_v49 = vpop.f32.mrf.mxu3 }
 0x63f   :  { %v1534_v51 = vadd.f32 %v1491_v49, %v1266_v32  ;;  %v1268_v32 = vpop.f32.mrf.mxu1 }
 0x640   :  { %v1269_v49 = vadd.f32 %v1268_v32, %v3298_v37 }
 0x641   :  { %v2539_v56 = vpop.eup %2538  ;;  %v2387_v22 = vmul.f32 -1.442695, %v1534_v51 }
 0x642   :  { %v1518_v7 = vadd.f32 1.0, %v2539_v56 }
 0x643   :  { %2540 = vpow2.f32 %v2387_v22  ;;  %v3373_v22 = vpop.f32.mrf.mxu0 }
 0x644   :  { %2542 = vrcp.f32 %v1518_v7  ;;  %v1530_v39 = vand.u32 2147483648, %v1518_v7  ;;  %v1528_v40 = vand.u32 2147483647, %v1518_v7  ;;  %vm1524_vm14 = vweird.f32 %v1518_v7 }
 0x646   :  { %v1511_v43 = vpop.f32.mrf.mxu3  ;;  %v1531_v41 = vor.u32 1.1754944e-38, %v1530_v39  ;;  %vm1529_vm1 = vcmp.eq.f32.partialorder %v1528_v40, 8.507059e+37 }
 0x647   :  { %v1554_v44 = vadd.f32 %v3309_v26, %v1511_v43 }
 0x649   :  { %v2541_v1 = vpop.eup %2540 }
 0x64a   :  { %v2543_v3 = vpop.eup %2542  ;;  %v1538_v34 = vadd.f32 1.0, %v2541_v1 }
 0x64b   :  { %v1520_v27 = vmul.f32 %v2543_v3, %v1518_v7  ;;  %vm1525_vm13 = vweird.f32 %v2543_v3 }
 0x64c   :  { %2544 = vrcp.f32 %v1538_v34  ;;  %vm1526_vm15 = vmor %vm1524_vm14, %vm1525_vm13  ;;  %v1550_v21 = vand.u32 2147483648, %v1538_v34  ;;  %v1548_v5 = vand.u32 2147483647, %v1538_v34  ;;  %vm1544_vm3 = vweird.f32 %v1538_v34 }
 0x64d   :  { %v1521_v36 = vsub.f32 1.0, %v1520_v27 }
 0x64e   :  { %v1551_v50 = vor.u32 1.1754944e-38, %v1550_v21  ;;  %vm1549_vm5 = vcmp.eq.f32.partialorder %v1548_v5, 8.507059e+37 }
 0x64f   :  { %v1522_v38 = vmul.f32 %v2543_v3, %v1521_v36 }
 0x651   :  { %v1523_v2 = vadd.f32 %v2543_v3, %v1522_v38 }
 0x652   :  { %v2545_v16 = vpop.eup %2544 }
 0x653   :  { %v1540_v42 = vmul.f32 %v2545_v16, %v1538_v34  ;;  %v1527_v58 = vsel %vm1526_vm15, %v2543_v3, %v1523_v2  ;;  %vm1545_vm2 = vweird.f32 %v2545_v16  ;;  %v3375_v34 = vpop.f32.mrf.mxu0 }
 0x654   :  { %v1532_v45 = vsel %vm1529_vm1, %v1531_v41, %v1527_v58  ;;  %vm1546_vm4 = vmor %vm1544_vm3, %vm1545_vm2  ;;  %v1309_v58 = vpop.f32.mrf.mxu2 }
 0x655   :  { %v1541_v46 = vsub.f32 1.0, %v1540_v42  ;;  %v1555_v48 = vmul.f32 %v1554_v44, %v1532_v45  ;;  %v1310_v21 = vadd.f32 %v1309_v58, %v3313_v47 }
 0x657   :  { %v1542_v6 = vmul.f32 %v2545_v16, %v1541_v46  ;;  %v1556_v12 = vadd.f32 %v1555_v48, %v1307_v19 }
 0x659   :  { %v1543_v25 = vadd.f32 %v2545_v16, %v1542_v6  ;;  %2546 = vtanh.f32 %v1556_v12 }
 0x65b   :  { %v1547_v52 = vsel %vm1546_vm4, %v2545_v16, %v1543_v25 }
 0x65c   :  { %v1552_v53 = vsel %vm1549_vm5, %v1551_v50, %v1547_v52  ;;  %v1312_v32 = vpop.f32.mrf.mxu2 }
 0x65d   :  { %v1558_v55 = vsub.f32 1.0, %v1552_v53  ;;  %v1560_v33 = vmul.f32 %v1552_v53, %v3320_v14 }
 0x65f   :  { %v2547_v57 = vpop.eup %2546 }
 0x660   :  { %v1559_v4 = vmul.f32 %v2547_v57, %v1558_v55 }
 0x662   :  { %v3345_v8 = vadd.f32 %v1560_v33, %v1559_v4 }
 0x664   :  { %2388 = vmatmul.msk.f32.vlgmr.msrb.gmra.mxu3 %vm129_vm0, %v3345_v8  ;;  %2390 = vmatmul.msk.f32.vlgmr.msra.gmra.mxu0 %vm129_vm0, %v3345_v8 }
 0x665   :  { %1728 = vmatpush.msrb.mxu3 %v3186_v59  ;;  %1930 = vmatpush.msra.mxu0 %v3195_v23 }
 0x667   :  { %1729 = vmatpush.msrb.mxu3 %v3189_v18  ;;  %1931 = vmatpush.msra.mxu0 %v3205_v24 }
 0x669   :  { %1730 = vmatpush.msrb.mxu3 %v3207_v28  ;;  %1932 = vmatpush.msra.mxu0 %v3211_v35 }
 0x66b   :  { %1731 = vmatpush.msrb.mxu3 %v3213_v13  ;;  %1933 = vmatpush.msra.mxu0 %v3223_v20 }
 0x66c   :  { %2389 = vmatmul.msk.f32.vlgmr.msra.gmra.mxu3 %vm129_vm0, %v3345_v8 }
 0x66d   :  { %1910 = vmatpush.msra.mxu3 %v3171_v29 }
 0x66f   :  { %1911 = vmatpush.msra.mxu3 %v3174_v63 }
 0x671   :  { %1912 = vmatpush.msra.mxu3 %v3176_v61 }
 0x673   :  { %1913 = vmatpush.msra.mxu3 %v3179_v30 }
 0x6e1   :  { %v1622_v54 = vpop.f32.mrf.mxu0 }
 0x6e2   :  { %v1665_v45 = vadd.f32 %v3309_v26, %v1622_v54 }
 0x6e7   :  { %v1582_v62 = vpop.f32.mrf.mxu3 }
 0x6e8   :  { %v1625_v60 = vadd.f32 %v1582_v62, %v1228_v17 }
 0x6ea   :  { %v2391_v9 = vmul.f32 -1.442695, %v1625_v60 }
 0x6ec   :  { %2548 = vpow2.f32 %v2391_v9  ;;  %v1271_v9 = vpop.f32.mrf.mxu1 }
 0x6ef   :  { %v1602_v51 = vpop.f32.mrf.mxu3 }
 0x6f0   :  { %v1645_v56 = vadd.f32 %v1602_v51, %v1269_v49  ;;  %v3402_v51 = vpop.f32.mrf.mxu2 }
 0x6f2   :  { %v2549_v7 = vpop.eup %2548  ;;  %v2392_v1 = vmul.f32 -1.442695, %v1645_v56 }
 0x6f3   :  { %v1629_v3 = vadd.f32 1.0, %v2549_v7 }
 0x6f4   :  { %2550 = vpow2.f32 %v2392_v1  ;;  %v3400_v49 = vpop.f32.mrf.mxu1 }
 0x6f5   :  { %2552 = vrcp.f32 %v1629_v3  ;;  %v1641_v43 = vand.u32 2147483648, %v1629_v3  ;;  %v1639_v16 = vand.u32 2147483647, %v1629_v3  ;;  %vm1635_vm7 = vweird.f32 %v1629_v3 }
 0x6f7   :  { %v1642_v44 = vor.u32 1.1754944e-38, %v1641_v43  ;;  %vm1640_vm9 = vcmp.eq.f32.partialorder %v1639_v16, 8.507059e+37 }
 0x6f8   :  { %v3406_v7 = vpop.f32.mrf.mxu2 }
 0x6fa   :  { %v2551_v27 = vpop.eup %2550 }
 0x6fb   :  { %v2553_v36 = vpop.eup %2552  ;;  %v1649_v39 = vadd.f32 1.0, %v2551_v27 }
 0x6fc   :  { %v1631_v38 = vmul.f32 %v2553_v36, %v1629_v3  ;;  %vm1636_vm6 = vweird.f32 %v2553_v36  ;;  %v3404_v56 = vpop.f32.mrf.mxu1 }
 0x6fd   :  { %2554 = vrcp.f32 %v1649_v39  ;;  %vm1637_vm8 = vmor %vm1635_vm7, %vm1636_vm6  ;;  %v1661_v12 = vand.u32 2147483648, %v1649_v39  ;;  %v1659_v50 = vand.u32 2147483647, %v1649_v39  ;;  %vm1655_vm11 = vweird.f32 %v1649_v39 }
 0x6fe   :  { %v1632_v40 = vsub.f32 1.0, %v1631_v38 }
 0x6ff   :  { %v1662_v55 = vor.u32 1.1754944e-38, %v1661_v12  ;;  %vm1660_vm13 = vcmp.eq.f32.partialorder %v1659_v50, 8.507059e+37 }
 0x700   :  { %v1633_v2 = vmul.f32 %v2553_v36, %v1632_v40  ;;  %v3410_v3 = vpop.f32.mrf.mxu2 }
 0x702   :  { %v1634_v41 = vadd.f32 %v2553_v36, %v1633_v2  ;;  %v1272_v2 = vadd.f32 %v1271_v9, %v3298_v37 }
 0x703   :  { %v2555_v42 = vpop.eup %2554 }
 0x704   :  { %v1638_v19 = vsel %vm1637_vm8, %v2553_v36, %v1634_v41  ;;  %v1651_v46 = vmul.f32 %v2555_v42, %v1649_v39  ;;  %vm1656_vm10 = vweird.f32 %v2555_v42  ;;  %v3408_v1 = vpop.f32.mrf.mxu1  ;;  %v1231_v39 = vadd.f32 %v3365_v11, %v3294_v31 }
 0x705   :  { %v1643_v48 = vsel %vm1640_vm9, %v1642_v44, %v1638_v19  ;;  %vm1657_vm12 = vmor %vm1655_vm11, %vm1656_vm10 }
 0x706   :  { %v1666_v6 = vmul.f32 %v1665_v45, %v1643_v48  ;;  %v1652_v5 = vsub.f32 1.0, %v1651_v46 }
 0x708   :  { %v1653_v25 = vmul.f32 %v2555_v42, %v1652_v5  ;;  %v1667_v52 = vadd.f32 %v1666_v6, %v1310_v21  ;;  %v3414_v36 = vpop.f32.mrf.mxu2 }
 0x70a   :  { %v1654_v53 = vadd.f32 %v2555_v42, %v1653_v25  ;;  %2556 = vtanh.f32 %v1667_v52 }
 0x70c   :  { %v1658_v57 = vsel %vm1657_vm12, %v2555_v42, %v1654_v53  ;;  %v3412_v27 = vpop.f32.mrf.mxu1 }
 0x70d   :  { %v1663_v4 = vsel %vm1660_vm13, %v1662_v55, %v1658_v57 }
 0x70e   :  { %v1669_v33 = vsub.f32 1.0, %v1663_v4  ;;  %v1671_v62 = vmul.f32 %v1663_v4, %v3345_v8  ;;  %v1313_v4 = vadd.f32 %v1312_v32, %v3313_v47 }
 0x710   :  { %v2557_v10 = vpop.eup %2556 }
 0x711   :  { %v1670_v17 = vmul.f32 %v2557_v10, %v1669_v33 }
 0x713   :  { %v3380_v60 = vadd.f32 %v1671_v62, %v1670_v17 }
 0x715   :  { %2393 = vmatmul.msk.f32.vlgmr.msrb.gmra.mxu1 %vm129_vm0, %v3380_v60  ;;  %2394 = vmatmul.msk.f32.vlgmr.msrb.gmra.mxu2 %vm129_vm0, %v3380_v60 }
 0x716   :  { %2395 = vmatmul.msk.f32.vlgmr.msrb.gmra.mxu3 %vm129_vm0, %v3380_v60  ;;  %1950 = vmatpush.msrb.mxu1 %v3186_v59 }
 0x717   :  { %2021 = vmatpush.msrb.mxu2 %v3171_v29  ;;  %2041 = vmatpush.msrb.mxu3 %v3195_v23 }
 0x718   :  { %1951 = vmatpush.msrb.mxu1 %v3189_v18 }
 0x719   :  { %2022 = vmatpush.msrb.mxu2 %v3174_v63  ;;  %2042 = vmatpush.msrb.mxu3 %v3205_v24 }
 0x71a   :  { %1952 = vmatpush.msrb.mxu1 %v3207_v28 }
 0x71b   :  { %2023 = vmatpush.msrb.mxu2 %v3176_v61  ;;  %2043 = vmatpush.msrb.mxu3 %v3211_v35 }
 0x71c   :  { %1953 = vmatpush.msrb.mxu1 %v3213_v13 }
 0x71d   :  { %2024 = vmatpush.msrb.mxu2 %v3179_v30  ;;  %2044 = vmatpush.msrb.mxu3 %v3223_v20 }
 0x792   :  { %v1693_v38 = vpop.f32.mrf.mxu1 }
 0x793   :  { %v1736_v40 = vadd.f32 %v1693_v38, %v1231_v39 }
 0x795   :  { %v2396_v43 = vmul.f32 -1.442695, %v1736_v40 }
 0x797   :  { %2558 = vpow2.f32 %v2396_v43 }
 0x798   :  { %v1713_v16 = vpop.f32.mrf.mxu2 }
 0x799   :  { %v1756_v54 = vadd.f32 %v1713_v16, %v1272_v2  ;;  %v1733_v12 = vpop.f32.mrf.mxu3 }
 0x79a   :  { %v1776_v57 = vadd.f32 %v3309_v26, %v1733_v12 }
 0x79b   :  { %v2397_v41 = vmul.f32 -1.442695, %v1756_v54 }
 0x79d   :  { %v2559_v42 = vpop.eup %2558  ;;  %2560 = vpow2.f32 %v2397_v41 }
 0x79e   :  { %v1740_v58 = vadd.f32 1.0, %v2559_v42 }
 0x7a0   :  { %2562 = vrcp.f32 %v1740_v58  ;;  %v1752_v11 = vand.u32 2147483648, %v1740_v58  ;;  %v1750_v6 = vand.u32 2147483647, %v1740_v58  ;;  %vm1746_vm15 = vweird.f32 %v1740_v58 }
 0x7a2   :  { %v1753_v52 = vor.u32 1.1754944e-38, %v1752_v11  ;;  %vm1751_vm2 = vcmp.eq.f32.partialorder %v1750_v6, 8.507059e+37 }
 0x7a3   :  { %v2561_v44 = vpop.eup %2560 }
 0x7a4   :  { %v1760_v45 = vadd.f32 1.0, %v2561_v44 }
 0x7a6   :  { %v2563_v19 = vpop.eup %2562  ;;  %2564 = vrcp.f32 %v1760_v45  ;;  %v1772_v17 = vand.u32 2147483648, %v1760_v45  ;;  %v1770_v9 = vand.u32 2147483647, %v1760_v45  ;;  %vm1766_vm4 = vweird.f32 %v1760_v45 }
 0x7a7   :  { %v1742_v46 = vmul.f32 %v2563_v19, %v1740_v58  ;;  %vm1747_vm14 = vweird.f32 %v2563_v19 }
 0x7a8   :  { %vm1748_vm1 = vmor %vm1746_vm15, %vm1747_vm14  ;;  %v1773_v40 = vor.u32 1.1754944e-38, %v1772_v17  ;;  %vm1771_vm6 = vcmp.eq.f32.partialorder %v1770_v9, 8.507059e+37 }
 0x7a9   :  { %v1743_v48 = vsub.f32 1.0, %v1742_v46 }
 0x7ab   :  { %v1744_v21 = vmul.f32 %v2563_v19, %v1743_v48 }
 0x7ac   :  { %v2565_v5 = vpop.eup %2564 }
 0x7ad   :  { %v1762_v25 = vmul.f32 %v2565_v5, %v1760_v45  ;;  %v1745_v50 = vadd.f32 %v2563_v19, %v1744_v21  ;;  %vm1767_vm3 = vweird.f32 %v2565_v5 }
 0x7ae   :  { %vm1768_vm5 = vmor %vm1766_vm4, %vm1767_vm3 }
 0x7af   :  { %v1763_v53 = vsub.f32 1.0, %v1762_v25  ;;  %v1749_v55 = vsel %vm1748_vm1, %v2563_v19, %v1745_v50 }
 0x7b0   :  { %v1754_v33 = vsel %vm1751_vm2, %v1753_v52, %v1749_v55 }
 0x7b1   :  { %v1764_v10 = vmul.f32 %v2565_v5, %v1763_v53  ;;  %v1777_v62 = vmul.f32 %v1776_v57, %v1754_v33 }
 0x7b3   :  { %v1765_v39 = vadd.f32 %v2565_v5, %v1764_v10  ;;  %v1778_v38 = vadd.f32 %v1777_v62, %v1313_v4  ;;  %v1316_v10 = vadd.f32 %v3402_v51, %v3313_v47  ;;  %v1278_v51 = vadd.f32 %v3404_v56, %v3298_v37  ;;  %v2231_v56 = vld [vmem:[%s3582_s9 + $0x18] sm:$0xff] }
 0x7b5   :  { %v1769_v43 = vsel %vm1768_vm5, %v2565_v5, %v1765_v39  ;;  %2566 = vtanh.f32 %v1778_v38 }
 0x7b6   :  { %v1774_v2 = vsel %vm1771_vm6, %v1773_v40, %v1769_v43 }
 0x7b7   :  { %v1780_v16 = vsub.f32 1.0, %v1774_v2  ;;  %v1782_v32 = vmul.f32 %v1774_v2, %v3380_v60 }
 0x7bb   :  { %v2567_v54 = vpop.eup %2566 }
 0x7bc   :  { %v1781_v41 = vmul.f32 %v2567_v54, %v1780_v16 }
 0x7be   :  { %v3422_v42 = vadd.f32 %v1782_v32, %v1781_v41 }
 0x7c0   :  { %2398 = vmatmul.msk.f32.vlgmr.msrb.gmra.mxu0 %vm129_vm0, %v3422_v42  ;;  %2399 = vmatmul.msk.f32.vlgmr.msra.gmra.mxu1 %vm129_vm0, %v3422_v42 }
 0x7c1   :  { %2400 = vmatmul.msk.f32.vlgmr.msra.gmra.mxu2 %vm129_vm0, %v3422_v42  ;;  %2061 = vmatpush.msrb.mxu0 %v3186_v59 }
 0x7c2   :  { %2132 = vmatpush.msra.mxu1 %v3171_v29  ;;  %2152 = vmatpush.msra.mxu2 %v3195_v23  ;;  %v1234_v29 = vadd.f32 %v3367_v15, %v3294_v31 }
 0x7c3   :  { %2062 = vmatpush.msrb.mxu0 %v3189_v18 }
 0x7c4   :  { %2133 = vmatpush.msra.mxu1 %v3174_v63  ;;  %2153 = vmatpush.msra.mxu2 %v3205_v24  ;;  %v1275_v63 = vadd.f32 %v3400_v49, %v3298_v37 }
 0x7c5   :  { %2063 = vmatpush.msrb.mxu0 %v3207_v28 }
 0x7c6   :  { %2134 = vmatpush.msra.mxu1 %v3176_v61  ;;  %2154 = vmatpush.msra.mxu2 %v3211_v35 }
 0x7c7   :  { %2064 = vmatpush.msrb.mxu0 %v3213_v13 }
 0x7c8   :  { %2135 = vmatpush.msra.mxu1 %v3179_v30  ;;  %2155 = vmatpush.msra.mxu2 %v3223_v20 }
 0x83d   :  { %v1804_v23 = vpop.f32.mrf.mxu0  ;;  %v1824_v24 = vpop.f32.mrf.mxu1 }
 0x83e   :  { %v1847_v58 = vadd.f32 %v1804_v23, %v1234_v29  ;;  %v1867_v44 = vadd.f32 %v1824_v24, %v1275_v63  ;;  %v1237_v24 = vadd.f32 %v3370_v0, %v3294_v31  ;;  %v2230_v0 = vld [vmem:[%s3582_s9 + $0x10] sm:$0xff] }
 0x840   :  { %v2401_v45 = vmul.f32 -1.442695, %v1847_v58  ;;  %v2402_v61 = vmul.f32 -1.442695, %v1867_v44 }
 0x842   :  { %2568 = vpow2.f32 %v2401_v45 }
 0x843   :  { %2570 = vpow2.f32 %v2402_v61 }
 0x844   :  { %v1844_v50 = vpop.f32.mrf.mxu2 }
 0x845   :  { %v1887_v57 = vadd.f32 %v3309_v26, %v1844_v50 }
 0x848   :  { %v2569_v35 = vpop.eup %2568 }
 0x849   :  { %v2571_v19 = vpop.eup %2570  ;;  %v1851_v46 = vadd.f32 1.0, %v2569_v35  ;;  %v2229_v35 = vld [vmem:[%s3582_s9 + $0x8] sm:$0xff] }
 0x84a   :  { %v1871_v30 = vadd.f32 1.0, %v2571_v19 }
 0x84b   :  { %2572 = vrcp.f32 %v1851_v46  ;;  %v1863_v6 = vand.u32 2147483648, %v1851_v46  ;;  %v1861_v12 = vand.u32 2147483647, %v1851_v46  ;;  %vm1857_vm8 = vweird.f32 %v1851_v46 }
 0x84c   :  { %2574 = vrcp.f32 %v1871_v30  ;;  %v1883_v17 = vand.u32 2147483648, %v1871_v30  ;;  %vm1877_vm12 = vweird.f32 %v1871_v30  ;;  %v1881_v9 = vand.u32 2147483647, %v1871_v30 }
 0x84d   :  { %v1864_v53 = vor.u32 1.1754944e-38, %v1863_v6  ;;  %vm1862_vm10 = vcmp.eq.f32.partialorder %v1861_v12, 8.507059e+37 }
 0x84e   :  { %v1884_v40 = vor.u32 1.1754944e-38, %v1883_v17  ;;  %vm1882_vm14 = vcmp.eq.f32.partialorder %v1881_v9, 8.507059e+37 }
 0x851   :  { %v2573_v20 = vpop.eup %2572 }
 0x852   :  { %v2575_v48 = vpop.eup %2574  ;;  %v1853_v15 = vmul.f32 %v2573_v20, %v1851_v46  ;;  %vm1858_vm7 = vweird.f32 %v2573_v20  ;;  %v2228_v46 = vld [vmem:[%s3582_s9] sm:$0xff] }
 0x853   :  { %v1873_v11 = vmul.f32 %v2575_v48, %v1871_v30  ;;  %vm1859_vm9 = vmor %vm1857_vm8, %vm1858_vm7  ;;  %vm1878_vm11 = vweird.f32 %v2575_v48  ;;  %vm2280_vm8 = vcmask 7168  }
 0x854   :  { %v1854_v21 = vsub.f32 1.0, %v1853_v15  ;;  %vm1879_vm13 = vmor %vm1877_vm12, %vm1878_vm11 }
 0x855   :  { %v1874_v49 = vsub.f32 1.0, %v1873_v11 }
 0x856   :  { %v1855_v5 = vmul.f32 %v2573_v20, %v1854_v21 }
 0x857   :  { %v1875_v25 = vmul.f32 %v2575_v48, %v1874_v49 }
 0x858   :  { %v1856_v52 = vadd.f32 %v2573_v20, %v1855_v5 }
 0x859   :  { %v1876_v4 = vadd.f32 %v2575_v48, %v1875_v25 }
 0x85a   :  { %v1860_v55 = vsel %vm1859_vm9, %v2573_v20, %v1856_v52 }
 0x85b   :  { %v1865_v33 = vsel %vm1862_vm10, %v1864_v53, %v1860_v55  ;;  %v1880_v38 = vsel %vm1879_vm13, %v2575_v48, %v1876_v4 }
 0x85c   :  { %v1888_v62 = vmul.f32 %v1887_v57, %v1865_v33  ;;  %v1885_v43 = vsel %vm1882_vm14, %v1884_v40, %v1880_v38  ;;  %v1319_v57 = vadd.f32 %v3406_v7, %v3313_v47 }
 0x85d   :  { %v1891_v2 = vsub.f32 1.0, %v1885_v43  ;;  %v1893_v41 = vmul.f32 %v1885_v43, %v3422_v42 }
 0x85e   :  { %v1889_v39 = vadd.f32 %v1888_v62, %v1316_v10 }
 0x860   :  { %2576 = vtanh.f32 %v1889_v39 }
 0x866   :  { %v2577_v16 = vpop.eup %2576 }
 0x867   :  { %v1892_v54 = vmul.f32 %v2577_v16, %v1891_v2 }
 0x869   :  { %v3450_v32 = vadd.f32 %v1893_v41, %v1892_v54  ;;  %v1240_v54 = vadd.f32 %v3373_v22, %v3294_v31 }
 0x86b   :  { %2403 = vmatmul.msk.f32.vlgmr.msra.gmra.mxu3 %vm129_vm0, %v3450_v32  ;;  %2404 = vmatmul.msk.f32.vlgmr.msra.gmra.mxu0 %vm129_vm0, %v3450_v32 }
 0x86c   :  { %2405 = vmatmul.msk.f32.vlgmr.msrb.gmra.mxu1 %vm129_vm0, %v3450_v32  ;;  %2172 = vmatpush.msra.mxu3 %v3186_v59 }
 0x86d   :  { %2251 = vmatpush.msra.mxu0 %v2231_v56 }
 0x86e   :  { %2173 = vmatpush.msra.mxu3 %v3189_v18 }
 0x86f   :  { %2252 = vmatpush.msra.mxu0 %v2230_v0 }
 0x870   :  { %2174 = vmatpush.msra.mxu3 %v3207_v28 }
 0x871   :  { %2253 = vmatpush.msra.mxu0 %v2229_v35 }
 0x872   :  { %2175 = vmatpush.msra.mxu3 %v3213_v13 }
 0x873   :  { %2254 = vmatpush.msra.mxu0 %v2228_v46 }
 0x8e8   :  { %v1935_v29 = vpop.f32.mrf.mxu0 }
 0x8e9   :  { %v1978_v63 = vadd.f32 %v1935_v29, %v1278_v51  ;;  %v1955_v5 = vpop.f32.mrf.mxu1  ;;  %v3506_v51 = vld [vmem:[#allocation2] ss:$0 sm:$0xff] }
 0x8ea   :  { %v1998_v50 = vadd.f32 %v3309_v26, %v1955_v5 }
 0x8eb   :  { %v2407_v23 = vmul.f32 -1.442695, %v1978_v63 }
 0x8ed   :  { %2578 = vpow2.f32 %v2407_v23 }
 0x8ee   :  { %v1915_v58 = vpop.f32.mrf.mxu3 }
 0x8ef   :  { %v1958_v44 = vadd.f32 %v1915_v58, %v1237_v24 }
 0x8f1   :  { %v2406_v45 = vmul.f32 -1.442695, %v1958_v44 }
 0x8f3   :  { %v2579_v59 = vpop.eup %2578  ;;  %2580 = vpow2.f32 %v2406_v45 }
 0x8f4   :  { %v1982_v18 = vadd.f32 1.0, %v2579_v59 }
 0x8f6   :  { %2582 = vrcp.f32 %v1982_v18  ;;  %v1994_v4 = vand.u32 2147483648, %v1982_v18  ;;  %vm1988_vm5 = vweird.f32 %v1982_v18  ;;  %v1992_v10 = vand.u32 2147483647, %v1982_v18 }
 0x8f8   :  { %v1995_v9 = vor.u32 1.1754944e-38, %v1994_v4  ;;  %vm1993_vm7 = vcmp.eq.f32.partialorder %v1992_v10, 8.507059e+37 }
 0x8f9   :  { %v2581_v28 = vpop.eup %2580 }
 0x8fa   :  { %v1962_v61 = vadd.f32 1.0, %v2581_v28 }
 0x8fc   :  { %2584 = vrcp.f32 %v1962_v61  ;;  %v2583_v13 = vpop.eup %2582  ;;  %v1974_v11 = vand.u32 2147483648, %v1962_v61  ;;  %v1972_v49 = vand.u32 2147483647, %v1962_v61  ;;  %vm1968_vm1 = vweird.f32 %v1962_v61 }
 0x8fd   :  { %v1984_v19 = vmul.f32 %v2583_v13, %v1982_v18  ;;  %vm1989_vm4 = vweird.f32 %v2583_v13 }
 0x8fe   :  { %v1975_v25 = vor.u32 1.1754944e-38, %v1974_v11  ;;  %vm1973_vm3 = vcmp.eq.f32.partialorder %v1972_v49, 8.507059e+37  ;;  %vm1990_vm6 = vmor %vm1988_vm5, %vm1989_vm4 }
 0x8ff   :  { %v1985_v48 = vsub.f32 1.0, %v1984_v19 }
 0x901   :  { %v1986_v6 = vmul.f32 %v2583_v13, %v1985_v48 }
 0x902   :  { %v2585_v30 = vpop.eup %2584 }
 0x903   :  { %v1964_v20 = vmul.f32 %v2585_v30, %v1962_v61  ;;  %vm1969_vm15 = vweird.f32 %v2585_v30  ;;  %v1987_v53 = vadd.f32 %v2583_v13, %v1986_v6 }
 0x904   :  { %vm1970_vm2 = vmor %vm1968_vm1, %vm1969_vm15 }
 0x905   :  { %v1965_v15 = vsub.f32 1.0, %v1964_v20  ;;  %v1991_v62 = vsel %vm1990_vm6, %v2583_v13, %v1987_v53 }
 0x906   :  { %v1996_v39 = vsel %vm1993_vm7, %v1995_v9, %v1991_v62 }
 0x907   :  { %v1966_v21 = vmul.f32 %v2585_v30, %v1965_v15  ;;  %v2002_v38 = vsub.f32 1.0, %v1996_v39  ;;  %v2004_v2 = vmul.f32 %v1996_v39, %v3450_v32 }
 0x909   :  { %v1967_v12 = vadd.f32 %v2585_v30, %v1966_v21 }
 0x90b   :  { %v1971_v52 = vsel %vm1970_vm2, %v2585_v30, %v1967_v12 }
 0x90c   :  { %v1976_v55 = vsel %vm1973_vm3, %v1975_v25, %v1971_v52  ;;  %v1322_v25 = vadd.f32 %v3410_v3, %v3313_v47 }
 0x90d   :  { %v1999_v33 = vmul.f32 %v1998_v50, %v1976_v55 }
 0x90f   :  { %v2000_v17 = vadd.f32 %v1999_v33, %v1319_v57 }
 0x911   :  { %2586 = vtanh.f32 %v2000_v17 }
 0x917   :  { %v2587_v40 = vpop.eup %2586 }
 0x918   :  { %v2003_v43 = vmul.f32 %v2587_v40, %v2002_v38 }
 0x91a   :  { %v3482_v16 = vadd.f32 %v2004_v2, %v2003_v43  ;;  %v1243_v43 = vadd.f32 %v3375_v34, %v3294_v31 }
 0x91c   :  { %2408 = vmatmul.msk.f32.vlgmr.msrb.gmra.mxu2 %vm129_vm0, %v3482_v16  ;;  %2409 = vmatmul.msk.f32.vlgmr.msrb.gmra.mxu3 %vm129_vm0, %v3482_v16 }
 0x91d   :  { %2410 = vmatmul.msk.f32.vlgmr.msrb.gmra.mxu0 %vm129_vm0, %v3482_v16 }
 0x925   :  { %2418 = vmatmul.msk.f32.vlgmr.msra.gmra.mxu0 %vm129_vm0, %v3320_v14  ;;  %v1281_v14 = vadd.f32 %v3408_v1, %v3298_v37 }
 0x92d   :  { %2419 = vmatmul.msk.f32.gmra.mxu0 %vm129_vm0, %v3345_v8 }
 0x935   :  { %2420 = vmatmul.msk.f32.gmra.mxu0 %vm129_vm0, %v3380_v60 }
 0x93d   :  { %2421 = vmatmul.msk.f32.gmra.mxu0 %vm129_vm0, %v3422_v42 }
 0x945   :  { %2422 = vmatmul.msk.f32.gmra.mxu0 %vm129_vm0, %v3450_v32 }
 0x94d   :  { %2423 = vmatmul.msk.f32.gmra.mxu0 %vm129_vm0, %v3482_v16 }
 0x99a   :  { %v2066_v7 = vpop.f32.mrf.mxu0 }
 0x99b   :  { %v2109_v49 = vadd.f32 %v3309_v26, %v2066_v7 }
 0x99f   :  { %v2026_v8 = vpop.f32.mrf.mxu2  ;;  %v2046_v41 = vpop.f32.mrf.mxu3 }
 0x9a0   :  { %v2069_v60 = vadd.f32 %v2026_v8, %v1240_v54  ;;  %v2089_v29 = vadd.f32 %v2046_v41, %v1281_v14  ;;  %v1284_v8 = vadd.f32 %v3412_v27, %v3298_v37 }
 0x9a2   :  { %v2411_v42 = vmul.f32 -1.442695, %v2069_v60  ;;  %v2412_v63 = vmul.f32 -1.442695, %v2089_v29  ;;  %v2256_v23 = vpop.f32.mrf.mxu0 }
 0x9a3   :  { %v2257_v32 = vadd.f32 %v3506_v51, %v2256_v23 }
 0x9a4   :  { %2588 = vpow2.f32 %v2411_v42 }
 0x9a5   :  { %2590 = vpow2.f32 %v2412_v63  ;;  %2281 = vst.msk [vmem:[%s3584_s11] sm:$0xff] %vm2280_vm8, %v2257_v32 }
 0x9aa   :  { %v2589_v22 = vpop.eup %2588  ;;  %v2259_v1 = vpop.f32.mrf.mxu0 }
 0x9ab   :  { %v2591_v24 = vpop.eup %2590  ;;  %v2073_v58 = vadd.f32 1.0, %v2589_v22  ;;  %v2260_v44 = vadd.f32 %v3506_v51, %v2259_v1 }
 0x9ac   :  { %v2093_v45 = vadd.f32 1.0, %v2591_v24 }
 0x9ad   :  { %2592 = vrcp.f32 %v2073_v58  ;;  %2282 = vst.msk [vmem:[%s3584_s11 + $0x8] sm:$0xff] %vm2280_vm8, %v2260_v44  ;;  %v2085_v35 = vand.u32 2147483648, %v2073_v58  ;;  %v2083_v30 = vand.u32 2147483647, %v2073_v58  ;;  %vm2079_vm10 = vweird.f32 %v2073_v58 }
 0x9ae   :  { %2594 = vrcp.f32 %v2093_v45  ;;  %v2105_v52 = vand.u32 2147483648, %v2093_v45  ;;  %vm2099_vm14 = vweird.f32 %v2093_v45  ;;  %v2103_v53 = vand.u32 2147483647, %v2093_v45 }
 0x9af   :  { %v2086_v11 = vor.u32 1.1754944e-38, %v2085_v35  ;;  %vm2084_vm12 = vcmp.eq.f32.partialorder %v2083_v30, 8.507059e+37 }
 0x9b0   :  { %v2106_v57 = vor.u32 1.1754944e-38, %v2105_v52  ;;  %vm2104_vm1 = vcmp.eq.f32.partialorder %v2103_v53, 8.507059e+37 }
 0x9b2   :  { %v2262_v59 = vpop.f32.mrf.mxu0 }
 0x9b3   :  { %v2593_v18 = vpop.eup %2592  ;;  %v2263_v28 = vadd.f32 %v3506_v51, %v2262_v59 }
 0x9b4   :  { %v2595_v61 = vpop.eup %2594  ;;  %v2075_v13 = vmul.f32 %v2593_v18, %v2073_v58  ;;  %vm2080_vm9 = vweird.f32 %v2593_v18 }
 0x9b5   :  { %v2095_v56 = vmul.f32 %v2595_v61, %v2093_v45  ;;  %2283 = vst.msk [vmem:[%s3584_s11 + $0x10] sm:$0xff] %vm2280_vm8, %v2263_v28  ;;  %vm2081_vm11 = vmor %vm2079_vm10, %vm2080_vm9  ;;  %vm2100_vm13 = vweird.f32 %v2595_v61 }
 0x9b6   :  { %v2076_v0 = vsub.f32 1.0, %v2075_v13  ;;  %vm2101_vm15 = vmor %vm2099_vm14, %vm2100_vm13 }
 0x9b7   :  { %v2096_v19 = vsub.f32 1.0, %v2095_v56  ;;  %v1325_v56 = vadd.f32 %v3414_v36, %v3313_v47 }
 0x9b8   :  { %v2077_v46 = vmul.f32 %v2593_v18, %v2076_v0 }
 0x9b9   :  { %v2097_v20 = vmul.f32 %v2595_v61, %v2096_v19 }
 0x9ba   :  { %v2078_v48 = vadd.f32 %v2593_v18, %v2077_v46  ;;  %v2265_v15 = vpop.f32.mrf.mxu0 }
 0x9bb   :  { %v2266_v21 = vadd.f32 %v3506_v51, %v2265_v15  ;;  %v2098_v12 = vadd.f32 %v2595_v61, %v2097_v20 }
 0x9bc   :  { %v2082_v6 = vsel %vm2081_vm11, %v2593_v18, %v2078_v48 }
 0x9bd   :  { %v2087_v5 = vsel %vm2084_vm12, %v2086_v11, %v2082_v6  ;;  %2284 = vst.msk [vmem:[%s3584_s11 + $0x18] sm:$0xff] %vm2280_vm8, %v2266_v21  ;;  %v2102_v26 = vsel %vm2101_vm15, %v2595_v61, %v2098_v12  ;;  %v2609_v61 = vld [vmem:[%s3581_s8] ss:$0 sm:$0xff] }
 0x9be   :  { %v2110_v50 = vmul.f32 %v2109_v49, %v2087_v5  ;;  %v2107_v10 = vsel %vm2104_vm1, %v2106_v57, %v2102_v26 }
 0x9bf   :  { %v2113_v3 = vsub.f32 1.0, %v2107_v10  ;;  %v2115_v9 = vmul.f32 %v2107_v10, %v3482_v16 }
 0x9c0   :  { %v2111_v55 = vadd.f32 %v2110_v50, %v1322_v25 }
 0x9c2   :  { %2596 = vtanh.f32 %v2111_v55  ;;  %v2268_v4 = vpop.f32.mrf.mxu0 }
 0x9c3   :  { %v2269_v33 = vadd.f32 %v3506_v51, %v2268_v4 }
 0x9c5   :  { %2285 = vst.msk [vmem:[%s3584_s11 + $0x20] sm:$0xff] %vm2280_vm8, %v2269_v33 }
 0x9c8   :  { %v2597_v17 = vpop.eup %2596 }
 0x9c9   :  { %v2114_v62 = vmul.f32 %v2597_v17, %v2113_v3 }
 0x9ca   :  { %v2271_v39 = vpop.f32.mrf.mxu0 }
 0x9cb   :  { %v2272_v38 = vadd.f32 %v3506_v51, %v2271_v39  ;;  %v3538_v40 = vadd.f32 %v2115_v9, %v2114_v62 }
 0x9cd   :  { %2286 = vst.msk [vmem:[%s3584_s11 + $0x28] sm:$0xff] %vm2280_vm8, %v2272_v38  ;;  %2413 = vmatmul.msk.f32.vlgmr.msra.gmra.mxu1 %vm129_vm0, %v3538_v40  ;;  %2414 = vmatmul.msk.f32.vlgmr.msra.gmra.mxu2 %vm129_vm0, %v3538_v40 }
 0x9ce   :  { %2415 = vmatmul.msk.f32.vlgmr.msra.gmra.mxu3 %vm129_vm0, %v3538_v40  ;;  %2424 = vmatmul.msk.f32.gmra.mxu0 %vm129_vm0, %v3538_v40 }
 0xa4a   :  { %v2137_v2 = vpop.f32.mrf.mxu1 }
 0xa4b   :  { %v2180_v16 = vadd.f32 %v2137_v2, %v1243_v43  ;;  %v2274_v7 = vpop.f32.mrf.mxu0 }
 0xa4c   :  { %v2275_v54 = vadd.f32 %v3506_v51, %v2274_v7 }
 0xa4d   :  { %v2416_v14 = vmul.f32 -1.442695, %v2180_v16 }
 0xa4e   :  { %2287 = vst.msk [vmem:[%s3584_s11 + $0x30] sm:$0xff] %vm2280_vm8, %v2275_v54 }
 0xa4f   :  { %2598 = vpow2.f32 %v2416_v14 }
 0xa50   :  { %v2157_v41 = vpop.f32.mrf.mxu2 }
 0xa51   :  { %v2200_v60 = vadd.f32 %v2157_v41, %v1284_v8  ;;  %v2177_v37 = vpop.f32.mrf.mxu3 }
 0xa52   :  { %v2220_v13 = vadd.f32 %v2609_v61, %v2177_v37 }
 0xa53   :  { %v2417_v29 = vmul.f32 -1.442695, %v2200_v60 }
 0xa55   :  { %v2599_v42 = vpop.eup %2598  ;;  %2600 = vpow2.f32 %v2417_v29 }
 0xa56   :  { %v2184_v31 = vadd.f32 1.0, %v2599_v42 }
 0xa58   :  { %2602 = vrcp.f32 %v2184_v31  ;;  %v2196_v1 = vand.u32 2147483648, %v2184_v31  ;;  %v2194_v58 = vand.u32 2147483647, %v2184_v31  ;;  %vm2190_vm3 = vweird.f32 %v2184_v31 }
 0xa5a   :  { %v2197_v59 = vor.u32 1.1754944e-38, %v2196_v1  ;;  %vm2195_vm5 = vcmp.eq.f32.partialorder %v2194_v58, 8.507059e+37 }
 0xa5b   :  { %v2601_v34 = vpop.eup %2600 }
 0xa5c   :  { %v2204_v63 = vadd.f32 1.0, %v2601_v34 }
 0xa5e   :  { %v2603_v23 = vpop.eup %2602  ;;  %2604 = vrcp.f32 %v2204_v63  ;;  %v2216_v46 = vand.u32 2147483648, %v2204_v63  ;;  %v2214_v30 = vand.u32 2147483647, %v2204_v63  ;;  %vm2210_vm7 = vweird.f32 %v2204_v63 }
 0xa5f   :  { %v2186_v32 = vmul.f32 %v2603_v23, %v2184_v31  ;;  %vm2191_vm2 = vweird.f32 %v2603_v23 }
 0xa60   :  { %vm2192_vm4 = vmor %vm2190_vm3, %vm2191_vm2  ;;  %v2217_v11 = vor.u32 1.1754944e-38, %v2216_v46  ;;  %vm2215_vm10 = vcmp.eq.f32.partialorder %v2214_v30, 8.507059e+37 }
 0xa61   :  { %v2187_v22 = vsub.f32 1.0, %v2186_v32 }
 0xa63   :  { %v2188_v24 = vmul.f32 %v2603_v23, %v2187_v22 }
 0xa64   :  { %v2605_v44 = vpop.eup %2604 }
 0xa65   :  { %v2206_v27 = vmul.f32 %v2605_v44, %v2204_v63  ;;  %v2189_v45 = vadd.f32 %v2603_v23, %v2188_v24  ;;  %vm2211_vm6 = vweird.f32 %v2605_v44 }
 0xa66   :  { %vm2212_vm9 = vmor %vm2210_vm7, %vm2211_vm6 }
 0xa67   :  { %v2207_v18 = vsub.f32 1.0, %v2206_v27  ;;  %v2193_v28 = vsel %vm2192_vm4, %v2603_v23, %v2189_v45 }
 0xa68   :  { %v2198_v0 = vsel %vm2195_vm5, %v2197_v59, %v2193_v28 }
 0xa69   :  { %v2208_v35 = vmul.f32 %v2605_v44, %v2207_v18  ;;  %v2221_v19 = vmul.f32 %v2220_v13, %v2198_v0 }
 0xa6b   :  { %v2222_v20 = vadd.f32 %v2221_v19, %v1325_v56  ;;  %v2209_v48 = vadd.f32 %v2605_v44, %v2208_v35 }
 0xa6d   :  { %2606 = vtanh.f32 %v2222_v20  ;;  %v2213_v15 = vsel %vm2212_vm9, %v2605_v44, %v2209_v48 }
 0xa6e   :  { %v2218_v21 = vsel %vm2215_vm10, %v2217_v11, %v2213_v15 }
 0xa6f   :  { %v2224_v49 = vsub.f32 1.0, %v2218_v21  ;;  %v2226_v47 = vmul.f32 %v2218_v21, %v3538_v40 }
 0xa73   :  { %v2607_v6 = vpop.eup %2606 }
 0xa74   :  { %v2225_v5 = vmul.f32 %v2607_v6, %v2224_v49 }
 0xa76   :  { %v2227_v36 = vadd.f32 %v2226_v47, %v2225_v5 }
 0xa78   :  { %2425 = vmatmul.msk.f32.gmra.mxu0 %vm129_vm0, %v2227_v36 }
 0xaf5   :  { %v2277_v12 = vpop.f32.mrf.mxu0 }
 0xaf6   :  { %v2278_v25 = vadd.f32 %v3506_v51, %v2277_v12 }
 0xaf8   :  { %2288 = vst.msk [vmem:[%s3584_s11 + $0x38] sm:$0xff] %vm2280_vm8, %v2278_v25 }
 0xaf9   :  { %2293 = vsyncpa [#allocation4], 1 }
 0xafa   :  { %2294 = vsyncpa [#allocation6], 1 }
 0xafb   :  { %2295 = vsyncpa [#allocation9], 1 }

</bundles_post_ra>
